<compile_context>
chip_gen: v7x
topology: tpu7x:2x2x1
jax: 0.10.0
libtpu: 0.0.40
codegen_flags: <defaults>
</compile_context>

<pallas_src>
import functools

import jax
import jax.numpy as jnp
from jax.experimental import pallas as pl
from jax.experimental.pallas import tpu as pltpu


_VMEM_LIMIT_CAP = 64 * 1024 * 1024  # valid on v5e/v6e (128 MiB) and v7x (64 MiB)


def _round_up(x, m):
    return (x + m - 1) // m * m


def _reorder_gates(m, H):
    """PyTorch LSTMCell gate order (i, f, g, o) -> packed order (i, f, o, g).

    `m` has the 4H gate axis leading (weights are (4H, in), biases (4H,))."""
    return jnp.concatenate([m[0 * H:2 * H], m[3 * H:4 * H], m[2 * H:3 * H]],
                           axis=0)


# ---------------------------------------------------------------------------
# Shared gate epilogue (all elementwise math in f32; gates packed [i, f, o, g]).
# ---------------------------------------------------------------------------
def _lstm_gates_to_hc(gates, c_prev, H):
    sg = jax.nn.sigmoid(gates[:, :3 * H])     # one contiguous EUP stream
    i_g = sg[:, 0 * H:1 * H]
    f_g = sg[:, 1 * H:2 * H]
    o_g = sg[:, 2 * H:3 * H]
    g_g = jnp.tanh(gates[:, 3 * H:4 * H])
    c_new = f_g * c_prev + i_g * g_g
    h_new = o_g * jnp.tanh(c_new)
    return h_new, c_new


# ---------------------------------------------------------------------------
# Mode A ("resident"): grid=(1,), whole weight stack resident in VMEM,
# unrolled in-kernel layer loop.  Used when the stack is small (demo sizes).
# ---------------------------------------------------------------------------
def _resident_kernel(x_ref, wx0_ref, h0_ref, c0_ref, w_ref, b_ref,
                     h1_ref, c1_ref):
    L, B, H = h0_ref.shape

    # Layer-0 prologue: x projection through its dedicated lane-padded weight.
    gx = jnp.dot(x_ref[...].astype(jnp.bfloat16), wx0_ref[...],
                 preferred_element_type=jnp.float32)

    inp = None  # bf16 inter-layer activation
    for l in range(L):  # static unroll — this path is only taken for small L*W
        w_l = w_ref[l]                                  # (2H, 4H) bf16
        gates = jnp.dot(h0_ref[l].astype(jnp.bfloat16), w_l[H:, :],
                        preferred_element_type=jnp.float32)
        if l == 0:
            gates = gates + gx
        else:
            gates = gates + jnp.dot(inp, w_l[:H, :],
                                    preferred_element_type=jnp.float32)
        gates = gates + b_ref[l]

        h_new, c_new = _lstm_gates_to_hc(gates, c0_ref[l].astype(jnp.float32), H)
        h1_ref[l] = h_new.astype(h1_ref.dtype)
        c1_ref[l] = c_new.astype(c1_ref.dtype)
        # TODO(synk): training-mode dropout on h_new between layers not applied.
        inp = h_new.astype(jnp.bfloat16)


# ---------------------------------------------------------------------------
# Mode B ("layer_grid"): one grid step == one layer; layer l+1's weight block
# is double-buffered under layer l's compute.  Exact K = 2H weight block.
# ---------------------------------------------------------------------------
def _layer_grid_kernel(x_ref, wx0_ref, h0_ref, c0_ref, w_ref, b_ref,
                       h1_ref, c1_ref, xh_ref, g_ref):
    l = pl.program_id(0)
    H = h0_ref.shape[2]

    # Layer 0: the input half of the concat buffer is unused (its weight rows
    # are zero) — clear it so no stale NaN/Inf can propagate through 0*x.
    @pl.when(l == 0)
    def _():
        xh_ref[:, :H] = jnp.zeros((xh_ref.shape[0], H), xh_ref.dtype)

    # This layer's previous hidden state goes in the tail of the buffer.
    xh_ref[:, H:] = h0_ref[0].astype(xh_ref.dtype)

    # Single fused K=2H bf16 matmul (f32 accumulation) for [inp, h0[l]].
    g_ref[...] = jnp.dot(xh_ref[...], w_ref[0],
                         preferred_element_type=jnp.float32) + b_ref[0]

    # Layer 0 only: add the x projection through its dedicated resident weight.
    @pl.when(l == 0)
    def _():
        g_ref[...] += jnp.dot(x_ref[...].astype(jnp.bfloat16), wx0_ref[...],
                              preferred_element_type=jnp.float32)

    h_new, c_new = _lstm_gates_to_hc(g_ref[...], c0_ref[0].astype(jnp.float32), H)
    h1_ref[0] = h_new.astype(h1_ref.dtype)
    c1_ref[0] = c_new.astype(c1_ref.dtype)

    # Feed h_new to the next layer as its input (dropout is identity in eval).
    # TODO(synk): training-mode dropout on h_new between layers not applied.
    @pl.when(l + 1 < pl.num_programs(0))
    def _():
        xh_ref[:, :H] = h_new.astype(xh_ref.dtype)


# ---------------------------------------------------------------------------
# Wrapper: one pallas_call for the whole stack.
#   packed = (W_x0, W, b):
#     W_x0 (Kx0, 4H) bf16, W (L, 2H, 4H) bf16, b (L, 1, 4H) f32
# ---------------------------------------------------------------------------
@functools.partial(jax.jit, static_argnames=("mode",))
def stacked_lstm_forward(x, hidden, packed, mode="auto"):
    h_0, c_0 = hidden
    wx0, w, b = packed
    L, B, H = h_0.shape
    Kx0 = wx0.shape[0]
    in_sz = x.shape[1]
    x_pad = x if in_sz == Kx0 else jnp.pad(x, ((0, 0), (0, Kx0 - in_sz)))

    w_bytes = (Kx0 * 4 * H + L * 2 * H * 4 * H) * 2     # bf16 weights
    state_bytes = 4 * L * B * H * 4                     # h0, c0, h1, c1 (f32)
    if mode == "auto":
        mode = "resident" if (w_bytes + state_bytes) <= (8 << 20) else "layer_grid"

    if mode == "resident":
        need = 2 * (w_bytes + state_bytes + B * Kx0 * 4 + L * 4 * H * 4)
        grid_spec = pltpu.PrefetchScalarGridSpec(
            num_scalar_prefetch=0,
            grid=(1,),
            in_specs=[
                pl.BlockSpec((B, Kx0), lambda i: (0, 0)),            # x
                pl.BlockSpec((Kx0, 4 * H), lambda i: (0, 0)),        # W_x0
                pl.BlockSpec((L, B, H), lambda i: (0, 0, 0)),        # h_0
                pl.BlockSpec((L, B, H), lambda i: (0, 0, 0)),        # c_0
                pl.BlockSpec((L, 2 * H, 4 * H), lambda i: (0, 0, 0)),  # W stack
                pl.BlockSpec((L, 1, 4 * H), lambda i: (0, 0, 0)),      # b stack
            ],
            out_specs=[
                pl.BlockSpec((L, B, H), lambda i: (0, 0, 0)),        # h_1
                pl.BlockSpec((L, B, H), lambda i: (0, 0, 0)),        # c_1
            ],
        )
        kernel = _resident_kernel
    else:
        per_layer = 2 * H * 4 * H * 2 + 4 * B * H * 4 + 4 * H * 4   # double-buffered
        resident = B * Kx0 * 4 + Kx0 * 4 * H * 2 + B * 2 * H * 2 + B * 4 * H * 4
        need = 2 * per_layer + resident + (4 << 20)
        grid_spec = pltpu.PrefetchScalarGridSpec(
            num_scalar_prefetch=0,
            grid=(L,),
            in_specs=[
                pl.BlockSpec((B, Kx0), lambda l: (0, 0)),            # x (resident)
                pl.BlockSpec((Kx0, 4 * H), lambda l: (0, 0)),        # W_x0 (resident)
                pl.BlockSpec((1, B, H), lambda l: (l, 0, 0)),        # h_0[l]
                pl.BlockSpec((1, B, H), lambda l: (l, 0, 0)),        # c_0[l]
                pl.BlockSpec((1, 2 * H, 4 * H), lambda l: (l, 0, 0)),  # W[l]
                pl.BlockSpec((1, 1, 4 * H), lambda l: (l, 0, 0)),      # b[l]
            ],
            out_specs=[
                pl.BlockSpec((1, B, H), lambda l: (l, 0, 0)),        # h_1[l]
                pl.BlockSpec((1, B, H), lambda l: (l, 0, 0)),        # c_1[l]
            ],
            scratch_shapes=[
                pltpu.VMEM((B, 2 * H), jnp.bfloat16),   # [inp, h0[l]] concat
                pltpu.VMEM((B, 4 * H), jnp.float32),    # gate accumulator
            ],
        )
        kernel = _layer_grid_kernel

    vmem_limit = int(min(_VMEM_LIMIT_CAP, max(32 << 20, need)))

    h_1, c_1 = pl.pallas_call(
        kernel,
        out_shape=(jax.ShapeDtypeStruct((L, B, H), h_0.dtype),
                   jax.ShapeDtypeStruct((L, B, H), c_0.dtype)),
        grid_spec=grid_spec,
        compiler_params=pltpu.CompilerParams(
            dimension_semantics=("arbitrary",),   # layer l+1 depends on layer l
            vmem_limit_bytes=vmem_limit),
    )(x_pad, wx0, h_0, c_0, w, b)

    # Module returns (input-after-last-layer, (h_1, c_1)); no dropout after last.
    return h_1[-1], (h_1, c_1)


# ---------------------------------------------------------------------------
# Parameter construction.
# Raw params follow nn.LSTMCell: weight_ih (4H, in), weight_hh (4H, H),
# bias_ih (4H,), bias_hh (4H,), uniform(-1/sqrt(H), 1/sqrt(H)).
# ---------------------------------------------------------------------------
def init_raw_params(key, num_layers, input_size, hidden_size, dtype=jnp.float32):
    raw = []
    bound = 1.0 / (hidden_size ** 0.5)
    in_sz = input_size
    for _ in range(num_layers):
        key, k1, k2, k3, k4 = jax.random.split(key, 5)
        w_ih = jax.random.uniform(k1, (4 * hidden_size, in_sz), dtype,
                                  minval=-bound, maxval=bound)
        w_hh = jax.random.uniform(k2, (4 * hidden_size, hidden_size), dtype,
                                  minval=-bound, maxval=bound)
        b_ih = jax.random.uniform(k3, (4 * hidden_size,), dtype,
                                  minval=-bound, maxval=bound)
        b_hh = jax.random.uniform(k4, (4 * hidden_size,), dtype,
                                  minval=-bound, maxval=bound)
        raw.append((w_ih, w_hh, b_ih, b_hh))
        in_sz = hidden_size
    return raw


def pack_params(raw, input_size, hidden_size, weight_dtype=jnp.bfloat16):
    """W_x0 (Kx0, 4H) bf16; W (L, 2H, 4H) bf16 with rows [0:H]=W_ih^T (zero for
    layer 0) and rows [H:2H]=W_hh^T; b (L, 1, 4H) f32 = b_ih + b_hh.
    Gate columns reordered from PyTorch (i, f, g, o) to (i, f, o, g)."""
    H = hidden_size
    Kx0 = _round_up(input_size, 128)
    wx0 = None
    ws, bs = [], []
    for li, (w_ih, w_hh, b_ih, b_hh) in enumerate(raw):
        w_ih_r = _reorder_gates(w_ih, H)               # (4H, in)
        w_hh_r = _reorder_gates(w_hh, H)               # (4H, H)
        b_r = _reorder_gates(b_ih + b_hh, H)           # (4H,)
        if li == 0:
            wx0 = (jnp.zeros((Kx0, 4 * H), jnp.float32)
                   .at[:input_size, :].set(w_ih_r.T)).astype(weight_dtype)
            w_l = (jnp.zeros((2 * H, 4 * H), jnp.float32)
                   .at[H:, :].set(w_hh_r.T))
        else:
            w_l = jnp.concatenate([w_ih_r.T, w_hh_r.T], axis=0)
        ws.append(w_l.astype(weight_dtype))
        bs.append(b_r[None, :].astype(jnp.float32))
    return wx0, jnp.stack(ws), jnp.stack(bs)


# Pure-JAX reference (same bf16-rounded weights, f32 math) for a sanity check.
def _reference_forward(x, hidden, raw, weight_dtype=jnp.bfloat16):
    h_0, c_0 = hidden
    inp = x
    h_1, c_1 = [], []
    for i, (w_ih, w_hh, b_ih, b_hh) in enumerate(raw):
        H = w_hh.shape[1]
        w_ih_f = w_ih.astype(weight_dtype).astype(jnp.float32)
        w_hh_f = w_hh.astype(weight_dtype).astype(jnp.float32)
        gates = inp @ w_ih_f.T + h_0[i] @ w_hh_f.T + b_ih + b_hh
        ig = jax.nn.sigmoid(gates[:, 0 * H:1 * H])
        fg = jax.nn.sigmoid(gates[:, 1 * H:2 * H])
        gg = jnp.tanh(gates[:, 2 * H:3 * H])
        og = jax.nn.sigmoid(gates[:, 3 * H:4 * H])
        c_new = fg * c_0[i] + ig * gg
        h_new = og * jnp.tanh(c_new)
        inp = h_new
        h_1.append(h_new)
        c_1.append(c_new)
    return inp, (jnp.stack(h_1), jnp.stack(c_1))


if __name__ == "__main__":
    num_layers = 3
    input_size = 64
    hidden_size = 128
    batch = 8

    key = jax.random.PRNGKey(0)
    key, kx, kh, kc, kp = jax.random.split(key, 5)

    x = jax.random.normal(kx, (batch, input_size), jnp.float32)
    h0 = jax.random.normal(kh, (num_layers, batch, hidden_size), jnp.float32)
    c0 = jax.random.normal(kc, (num_layers, batch, hidden_size), jnp.float32)

    raw = init_raw_params(kp, num_layers, input_size, hidden_size)
    packed = pack_params(raw, input_size, hidden_size)

    out_r, (h1_r, c1_r) = _reference_forward(x, (h0, c0), raw)

    # Exercise both execution modes ("auto" would pick "resident" at this size).
    for mode in ("resident", "layer_grid"):
        out, (h1, c1) = stacked_lstm_forward(x, (h0, c0), packed, mode=mode)
        jax.block_until_ready((out, h1, c1))
        assert jnp.allclose(out, out_r, atol=1e-2, rtol=1e-2), (
            mode, float(jnp.max(jnp.abs(out - out_r))))
        assert jnp.allclose(h1, h1_r, atol=1e-2, rtol=1e-2), mode
        assert jnp.allclose(c1, c1_r, atol=1e-2, rtol=1e-2), mode

    print("KERNEL_OK")
</pallas_src>

<mosaic_0001>
module attributes {stable_mosaic.version = 11 : i64} {
  func.func @_resident_kernel(%arg0: i32, %arg1: memref<8x128xf32, #tpu.memory_space<vmem>>, %arg2: memref<128x512xbf16, #tpu.memory_space<vmem>>, %arg3: memref<3x8x128xf32, #tpu.memory_space<vmem>>, %arg4: memref<3x8x128xf32, #tpu.memory_space<vmem>>, %arg5: memref<3x256x512xbf16, #tpu.memory_space<vmem>>, %arg6: memref<3x1x512xf32, #tpu.memory_space<vmem>>, %arg7: memref<3x8x128xf32, #tpu.memory_space<vmem>>, %arg8: memref<3x8x128xf32, #tpu.memory_space<vmem>>) attributes {dimension_semantics = [#tpu.dimension_semantics<arbitrary>], iteration_bounds = array<i64: 1>, scalar_prefetch = 0 : i64, scratch_operands = 0 : i64, tpu.core_type = #tpu.core_type<tc>, window_params = [{pipeline_mode = #tpu.pipeline_mode<synchronous>, transform_indices = @transform_0, window_bounds = array<i64: 8, 128>}, {pipeline_mode = #tpu.pipeline_mode<synchronous>, transform_indices = @transform_1, window_bounds = array<i64: 128, 512>}, {pipeline_mode = #tpu.pipeline_mode<synchronous>, transform_indices = @transform_2, window_bounds = array<i64: 3, 8, 128>}, {pipeline_mode = #tpu.pipeline_mode<synchronous>, transform_indices = @transform_3, window_bounds = array<i64: 3, 8, 128>}, {pipeline_mode = #tpu.pipeline_mode<synchronous>, transform_indices = @transform_4, window_bounds = array<i64: 3, 256, 512>}, {pipeline_mode = #tpu.pipeline_mode<synchronous>, transform_indices = @transform_5, window_bounds = array<i64: 3, 1, 512>}, {pipeline_mode = #tpu.pipeline_mode<synchronous>, transform_indices = @transform_6, window_bounds = array<i64: 3, 8, 128>}, {pipeline_mode = #tpu.pipeline_mode<synchronous>, transform_indices = @transform_7, window_bounds = array<i64: 3, 8, 128>}]} {
    %c0 = arith.constant 0 : index
    %c0_0 = arith.constant 0 : index
    %0 = vector.load %arg1[%c0, %c0_0] : memref<8x128xf32, #tpu.memory_space<vmem>>, vector<8x128xf32>
    %1 = arith.truncf %0 : vector<8x128xf32> to vector<8x128xbf16>
    %c0_1 = arith.constant 0 : index
    %c0_2 = arith.constant 0 : index
    %2 = vector.load %arg2[%c0_1, %c0_2] : memref<128x512xbf16, #tpu.memory_space<vmem>>, vector<128x512xbf16>
    %cst = arith.constant dense<0.000000e+00> : vector<8x512xf32>
    %3 = tpu.matmul %1, %2, %cst {dimension_numbers = #tpu.dot_dimension_numbers<[1], [0], [0], [1], [0, 0, 1, 1], [], []>} : vector<8x128xbf16>, vector<128x512xbf16>, vector<8x512xf32> -> vector<8x512xf32>
    %c0_3 = arith.constant 0 : index
    %c0_4 = arith.constant 0 : index
    %c0_5 = arith.constant 0 : index
    %4 = vector.load %arg5[%c0_3, %c0_4, %c0_5] : memref<3x256x512xbf16, #tpu.memory_space<vmem>>, vector<1x256x512xbf16>
    %5 = vector.shape_cast %4 : vector<1x256x512xbf16> to vector<256x512xbf16>
    %c0_6 = arith.constant 0 : index
    %c0_7 = arith.constant 0 : index
    %c0_8 = arith.constant 0 : index
    %6 = vector.load %arg3[%c0_6, %c0_7, %c0_8] : memref<3x8x128xf32, #tpu.memory_space<vmem>>, vector<1x8x128xf32>
    %7 = vector.shape_cast %6 : vector<1x8x128xf32> to vector<8x128xf32>
    %8 = arith.truncf %7 : vector<8x128xf32> to vector<8x128xbf16>
    %9 = vector.extract_strided_slice %5 {offsets = [128, 0], sizes = [128, 512], strides = [1, 1]} : vector<256x512xbf16> to vector<128x512xbf16>
    %cst_9 = arith.constant dense<0.000000e+00> : vector<8x512xf32>
    %10 = tpu.matmul %8, %9, %cst_9 {dimension_numbers = #tpu.dot_dimension_numbers<[1], [0], [0], [1], [0, 0, 1, 1], [], []>} : vector<8x128xbf16>, vector<128x512xbf16>, vector<8x512xf32> -> vector<8x512xf32>
    %11 = arith.addf %10, %3 : vector<8x512xf32>
    %c0_10 = arith.constant 0 : index
    %c0_11 = arith.constant 0 : index
    %c0_12 = arith.constant 0 : index
    %12 = vector.load %arg6[%c0_10, %c0_11, %c0_12] : memref<3x1x512xf32, #tpu.memory_space<vmem>>, vector<1x1x512xf32>
    %13 = vector.shape_cast %12 : vector<1x1x512xf32> to vector<1x512xf32>
    %14 = vector.broadcast %13 : vector<1x512xf32> to vector<8x512xf32>
    %15 = arith.addf %11, %14 : vector<8x512xf32>
    %c0_13 = arith.constant 0 : index
    %c0_14 = arith.constant 0 : index
    %c0_15 = arith.constant 0 : index
    %16 = vector.load %arg4[%c0_13, %c0_14, %c0_15] : memref<3x8x128xf32, #tpu.memory_space<vmem>>, vector<1x8x128xf32>
    %17 = vector.shape_cast %16 : vector<1x8x128xf32> to vector<8x128xf32>
    %18 = vector.extract_strided_slice %15 {offsets = [0, 0], sizes = [8, 384], strides = [1, 1]} : vector<8x512xf32> to vector<8x384xf32>
    %19 = arith.negf %18 : vector<8x384xf32>
    %20 = math.exp %19 : vector<8x384xf32>
    %cst_16 = arith.constant 1.000000e+00 : f32
    %21 = vector.broadcast %cst_16 : f32 to vector<8x384xf32>
    %22 = arith.addf %21, %20 : vector<8x384xf32>
    %23 = arith.divf %21, %22 : vector<8x384xf32>
    %24 = vector.extract_strided_slice %23 {offsets = [0, 0], sizes = [8, 128], strides = [1, 1]} : vector<8x384xf32> to vector<8x128xf32>
    %25 = vector.extract_strided_slice %23 {offsets = [0, 128], sizes = [8, 128], strides = [1, 1]} : vector<8x384xf32> to vector<8x128xf32>
    %26 = vector.extract_strided_slice %23 {offsets = [0, 256], sizes = [8, 128], strides = [1, 1]} : vector<8x384xf32> to vector<8x128xf32>
    %27 = vector.extract_strided_slice %15 {offsets = [0, 384], sizes = [8, 128], strides = [1, 1]} : vector<8x512xf32> to vector<8x128xf32>
    %28 = math.tanh %27 : vector<8x128xf32>
    %29 = arith.mulf %25, %17 : vector<8x128xf32>
    %30 = arith.mulf %24, %28 : vector<8x128xf32>
    %31 = arith.addf %29, %30 : vector<8x128xf32>
    %32 = math.tanh %31 : vector<8x128xf32>
    %33 = arith.mulf %26, %32 : vector<8x128xf32>
    %c0_17 = arith.constant 0 : index
    %c0_18 = arith.constant 0 : index
    %c0_19 = arith.constant 0 : index
    %34 = vector.load %arg7[%c0_17, %c0_18, %c0_19] : memref<3x8x128xf32, #tpu.memory_space<vmem>>, vector<1x8x128xf32>
    %35 = vector.shape_cast %34 : vector<1x8x128xf32> to vector<8x128xf32>
    %36 = vector.shape_cast %33 : vector<8x128xf32> to vector<1x8x128xf32>
    tpu.vector_store %arg7[%c0_17, %c0_18, %c0_19], %36 {strides = array<i32>} : memref<3x8x128xf32, #tpu.memory_space<vmem>>, vector<1x8x128xf32>,
    %c0_20 = arith.constant 0 : index
    %c0_21 = arith.constant 0 : index
    %c0_22 = arith.constant 0 : index
    %37 = vector.load %arg8[%c0_20, %c0_21, %c0_22] : memref<3x8x128xf32, #tpu.memory_space<vmem>>, vector<1x8x128xf32>
    %38 = vector.shape_cast %37 : vector<1x8x128xf32> to vector<8x128xf32>
    %39 = vector.shape_cast %31 : vector<8x128xf32> to vector<1x8x128xf32>
    tpu.vector_store %arg8[%c0_20, %c0_21, %c0_22], %39 {strides = array<i32>} : memref<3x8x128xf32, #tpu.memory_space<vmem>>, vector<1x8x128xf32>,
    %40 = arith.truncf %33 : vector<8x128xf32> to vector<8x128xbf16>
    %c1 = arith.constant 1 : index
    %c0_23 = arith.constant 0 : index
    %c0_24 = arith.constant 0 : index
    %41 = vector.load %arg5[%c1, %c0_23, %c0_24] : memref<3x256x512xbf16, #tpu.memory_space<vmem>>, vector<1x256x512xbf16>
    %42 = vector.shape_cast %41 : vector<1x256x512xbf16> to vector<256x512xbf16>
    %c1_25 = arith.constant 1 : index
    %c0_26 = arith.constant 0 : index
    %c0_27 = arith.constant 0 : index
    %43 = vector.load %arg3[%c1_25, %c0_26, %c0_27] : memref<3x8x128xf32, #tpu.memory_space<vmem>>, vector<1x8x128xf32>
    %44 = vector.shape_cast %43 : vector<1x8x128xf32> to vector<8x128xf32>
    %45 = arith.truncf %44 : vector<8x128xf32> to vector<8x128xbf16>
    %46 = vector.extract_strided_slice %42 {offsets = [128, 0], sizes = [128, 512], strides = [1, 1]} : vector<256x512xbf16> to vector<128x512xbf16>
    %cst_28 = arith.constant dense<0.000000e+00> : vector<8x512xf32>
    %47 = tpu.matmul %45, %46, %cst_28 {dimension_numbers = #tpu.dot_dimension_numbers<[1], [0], [0], [1], [0, 0, 1, 1], [], []>} : vector<8x128xbf16>, vector<128x512xbf16>, vector<8x512xf32> -> vector<8x512xf32>
    %48 = vector.extract_strided_slice %42 {offsets = [0, 0], sizes = [128, 512], strides = [1, 1]} : vector<256x512xbf16> to vector<128x512xbf16>
    %cst_29 = arith.constant dense<0.000000e+00> : vector<8x512xf32>
    %49 = tpu.matmul %40, %48, %cst_29 {dimension_numbers = #tpu.dot_dimension_numbers<[1], [0], [0], [1], [0, 0, 1, 1], [], []>} : vector<8x128xbf16>, vector<128x512xbf16>, vector<8x512xf32> -> vector<8x512xf32>
    %50 = arith.addf %47, %49 : vector<8x512xf32>
    %c1_30 = arith.constant 1 : index
    %c0_31 = arith.constant 0 : index
    %c0_32 = arith.constant 0 : index
    %51 = vector.load %arg6[%c1_30, %c0_31, %c0_32] : memref<3x1x512xf32, #tpu.memory_space<vmem>>, vector<1x1x512xf32>
    %52 = vector.shape_cast %51 : vector<1x1x512xf32> to vector<1x512xf32>
    %53 = vector.broadcast %52 : vector<1x512xf32> to vector<8x512xf32>
    %54 = arith.addf %50, %53 : vector<8x512xf32>
    %c1_33 = arith.constant 1 : index
    %c0_34 = arith.constant 0 : index
    %c0_35 = arith.constant 0 : index
    %55 = vector.load %arg4[%c1_33, %c0_34, %c0_35] : memref<3x8x128xf32, #tpu.memory_space<vmem>>, vector<1x8x128xf32>
    %56 = vector.shape_cast %55 : vector<1x8x128xf32> to vector<8x128xf32>
    %57 = vector.extract_strided_slice %54 {offsets = [0, 0], sizes = [8, 384], strides = [1, 1]} : vector<8x512xf32> to vector<8x384xf32>
    %58 = arith.negf %57 : vector<8x384xf32>
    %59 = math.exp %58 : vector<8x384xf32>
    %cst_36 = arith.constant 1.000000e+00 : f32
    %60 = vector.broadcast %cst_36 : f32 to vector<8x384xf32>
    %61 = arith.addf %60, %59 : vector<8x384xf32>
    %62 = arith.divf %60, %61 : vector<8x384xf32>
    %63 = vector.extract_strided_slice %62 {offsets = [0, 0], sizes = [8, 128], strides = [1, 1]} : vector<8x384xf32> to vector<8x128xf32>
    %64 = vector.extract_strided_slice %62 {offsets = [0, 128], sizes = [8, 128], strides = [1, 1]} : vector<8x384xf32> to vector<8x128xf32>
    %65 = vector.extract_strided_slice %62 {offsets = [0, 256], sizes = [8, 128], strides = [1, 1]} : vector<8x384xf32> to vector<8x128xf32>
    %66 = vector.extract_strided_slice %54 {offsets = [0, 384], sizes = [8, 128], strides = [1, 1]} : vector<8x512xf32> to vector<8x128xf32>
    %67 = math.tanh %66 : vector<8x128xf32>
    %68 = arith.mulf %64, %56 : vector<8x128xf32>
    %69 = arith.mulf %63, %67 : vector<8x128xf32>
    %70 = arith.addf %68, %69 : vector<8x128xf32>
    %71 = math.tanh %70 : vector<8x128xf32>
    %72 = arith.mulf %65, %71 : vector<8x128xf32>
    %c1_37 = arith.constant 1 : index
    %c0_38 = arith.constant 0 : index
    %c0_39 = arith.constant 0 : index
    %73 = vector.load %arg7[%c1_37, %c0_38, %c0_39] : memref<3x8x128xf32, #tpu.memory_space<vmem>>, vector<1x8x128xf32>
    %74 = vector.shape_cast %73 : vector<1x8x128xf32> to vector<8x128xf32>
    %75 = vector.shape_cast %72 : vector<8x128xf32> to vector<1x8x128xf32>
    tpu.vector_store %arg7[%c1_37, %c0_38, %c0_39], %75 {strides = array<i32>} : memref<3x8x128xf32, #tpu.memory_space<vmem>>, vector<1x8x128xf32>,
    %c1_40 = arith.constant 1 : index
    %c0_41 = arith.constant 0 : index
    %c0_42 = arith.constant 0 : index
    %76 = vector.load %arg8[%c1_40, %c0_41, %c0_42] : memref<3x8x128xf32, #tpu.memory_space<vmem>>, vector<1x8x128xf32>
    %77 = vector.shape_cast %76 : vector<1x8x128xf32> to vector<8x128xf32>
    %78 = vector.shape_cast %70 : vector<8x128xf32> to vector<1x8x128xf32>
    tpu.vector_store %arg8[%c1_40, %c0_41, %c0_42], %78 {strides = array<i32>} : memref<3x8x128xf32, #tpu.memory_space<vmem>>, vector<1x8x128xf32>,
    %79 = arith.truncf %72 : vector<8x128xf32> to vector<8x128xbf16>
    %c2 = arith.constant 2 : index
    %c0_43 = arith.constant 0 : index
    %c0_44 = arith.constant 0 : index
    %80 = vector.load %arg5[%c2, %c0_43, %c0_44] : memref<3x256x512xbf16, #tpu.memory_space<vmem>>, vector<1x256x512xbf16>
    %81 = vector.shape_cast %80 : vector<1x256x512xbf16> to vector<256x512xbf16>
    %c2_45 = arith.constant 2 : index
    %c0_46 = arith.constant 0 : index
    %c0_47 = arith.constant 0 : index
    %82 = vector.load %arg3[%c2_45, %c0_46, %c0_47] : memref<3x8x128xf32, #tpu.memory_space<vmem>>, vector<1x8x128xf32>
    %83 = vector.shape_cast %82 : vector<1x8x128xf32> to vector<8x128xf32>
    %84 = arith.truncf %83 : vector<8x128xf32> to vector<8x128xbf16>
    %85 = vector.extract_strided_slice %81 {offsets = [128, 0], sizes = [128, 512], strides = [1, 1]} : vector<256x512xbf16> to vector<128x512xbf16>
    %cst_48 = arith.constant dense<0.000000e+00> : vector<8x512xf32>
    %86 = tpu.matmul %84, %85, %cst_48 {dimension_numbers = #tpu.dot_dimension_numbers<[1], [0], [0], [1], [0, 0, 1, 1], [], []>} : vector<8x128xbf16>, vector<128x512xbf16>, vector<8x512xf32> -> vector<8x512xf32>
    %87 = vector.extract_strided_slice %81 {offsets = [0, 0], sizes = [128, 512], strides = [1, 1]} : vector<256x512xbf16> to vector<128x512xbf16>
    %cst_49 = arith.constant dense<0.000000e+00> : vector<8x512xf32>
    %88 = tpu.matmul %79, %87, %cst_49 {dimension_numbers = #tpu.dot_dimension_numbers<[1], [0], [0], [1], [0, 0, 1, 1], [], []>} : vector<8x128xbf16>, vector<128x512xbf16>, vector<8x512xf32> -> vector<8x512xf32>
    %89 = arith.addf %86, %88 : vector<8x512xf32>
    %c2_50 = arith.constant 2 : index
    %c0_51 = arith.constant 0 : index
    %c0_52 = arith.constant 0 : index
    %90 = vector.load %arg6[%c2_50, %c0_51, %c0_52] : memref<3x1x512xf32, #tpu.memory_space<vmem>>, vector<1x1x512xf32>
    %91 = vector.shape_cast %90 : vector<1x1x512xf32> to vector<1x512xf32>
    %92 = vector.broadcast %91 : vector<1x512xf32> to vector<8x512xf32>
    %93 = arith.addf %89, %92 : vector<8x512xf32>
    %c2_53 = arith.constant 2 : index
    %c0_54 = arith.constant 0 : index
    %c0_55 = arith.constant 0 : index
    %94 = vector.load %arg4[%c2_53, %c0_54, %c0_55] : memref<3x8x128xf32, #tpu.memory_space<vmem>>, vector<1x8x128xf32>
    %95 = vector.shape_cast %94 : vector<1x8x128xf32> to vector<8x128xf32>
    %96 = vector.extract_strided_slice %93 {offsets = [0, 0], sizes = [8, 384], strides = [1, 1]} : vector<8x512xf32> to vector<8x384xf32>
    %97 = arith.negf %96 : vector<8x384xf32>
    %98 = math.exp %97 : vector<8x384xf32>
    %cst_56 = arith.constant 1.000000e+00 : f32
    %99 = vector.broadcast %cst_56 : f32 to vector<8x384xf32>
    %100 = arith.addf %99, %98 : vector<8x384xf32>
    %101 = arith.divf %99, %100 : vector<8x384xf32>
    %102 = vector.extract_strided_slice %101 {offsets = [0, 0], sizes = [8, 128], strides = [1, 1]} : vector<8x384xf32> to vector<8x128xf32>
    %103 = vector.extract_strided_slice %101 {offsets = [0, 128], sizes = [8, 128], strides = [1, 1]} : vector<8x384xf32> to vector<8x128xf32>
    %104 = vector.extract_strided_slice %101 {offsets = [0, 256], sizes = [8, 128], strides = [1, 1]} : vector<8x384xf32> to vector<8x128xf32>
    %105 = vector.extract_strided_slice %93 {offsets = [0, 384], sizes = [8, 128], strides = [1, 1]} : vector<8x512xf32> to vector<8x128xf32>
    %106 = math.tanh %105 : vector<8x128xf32>
    %107 = arith.mulf %103, %95 : vector<8x128xf32>
    %108 = arith.mulf %102, %106 : vector<8x128xf32>
    %109 = arith.addf %107, %108 : vector<8x128xf32>
    %110 = math.tanh %109 : vector<8x128xf32>
    %111 = arith.mulf %104, %110 : vector<8x128xf32>
    %c2_57 = arith.constant 2 : index
    %c0_58 = arith.constant 0 : index
    %c0_59 = arith.constant 0 : index
    %112 = vector.load %arg7[%c2_57, %c0_58, %c0_59] : memref<3x8x128xf32, #tpu.memory_space<vmem>>, vector<1x8x128xf32>
    %113 = vector.shape_cast %112 : vector<1x8x128xf32> to vector<8x128xf32>
    %114 = vector.shape_cast %111 : vector<8x128xf32> to vector<1x8x128xf32>
    tpu.vector_store %arg7[%c2_57, %c0_58, %c0_59], %114 {strides = array<i32>} : memref<3x8x128xf32, #tpu.memory_space<vmem>>, vector<1x8x128xf32>,
    %c2_60 = arith.constant 2 : index
    %c0_61 = arith.constant 0 : index
    %c0_62 = arith.constant 0 : index
    %115 = vector.load %arg8[%c2_60, %c0_61, %c0_62] : memref<3x8x128xf32, #tpu.memory_space<vmem>>, vector<1x8x128xf32>
    %116 = vector.shape_cast %115 : vector<1x8x128xf32> to vector<8x128xf32>
    %117 = vector.shape_cast %109 : vector<8x128xf32> to vector<1x8x128xf32>
    tpu.vector_store %arg8[%c2_60, %c0_61, %c0_62], %117 {strides = array<i32>} : memref<3x8x128xf32, #tpu.memory_space<vmem>>, vector<1x8x128xf32>,
    return
  }
  func.func @transform_0(%arg0: i32) -> (i32, i32) {
    %c0_i32 = arith.constant 0 : i32
    %c0_i32_0 = arith.constant 0 : i32
    %c0_i32_1 = arith.constant 0 : i32
    return %c0_i32, %c0_i32_0 : i32, i32
  }
  func.func @transform_1(%arg0: i32) -> (i32, i32) {
    %c0_i32 = arith.constant 0 : i32
    %c0_i32_0 = arith.constant 0 : i32
    %c0_i32_1 = arith.constant 0 : i32
    return %c0_i32, %c0_i32_0 : i32, i32
  }
  func.func @transform_2(%arg0: i32) -> (i32, i32, i32) {
    %c0_i32 = arith.constant 0 : i32
    %c0_i32_0 = arith.constant 0 : i32
    %c0_i32_1 = arith.constant 0 : i32
    %c0_i32_2 = arith.constant 0 : i32
    return %c0_i32, %c0_i32_0, %c0_i32_1 : i32, i32, i32
  }
  func.func @transform_3(%arg0: i32) -> (i32, i32, i32) {
    %c0_i32 = arith.constant 0 : i32
    %c0_i32_0 = arith.constant 0 : i32
    %c0_i32_1 = arith.constant 0 : i32
    %c0_i32_2 = arith.constant 0 : i32
    return %c0_i32, %c0_i32_0, %c0_i32_1 : i32, i32, i32
  }
  func.func @transform_4(%arg0: i32) -> (i32, i32, i32) {
    %c0_i32 = arith.constant 0 : i32
    %c0_i32_0 = arith.constant 0 : i32
    %c0_i32_1 = arith.constant 0 : i32
    %c0_i32_2 = arith.constant 0 : i32
    return %c0_i32, %c0_i32_0, %c0_i32_1 : i32, i32, i32
  }
  func.func @transform_5(%arg0: i32) -> (i32, i32, i32) {
    %c0_i32 = arith.constant 0 : i32
    %c0_i32_0 = arith.constant 0 : i32
    %c0_i32_1 = arith.constant 0 : i32
    %c0_i32_2 = arith.constant 0 : i32
    return %c0_i32, %c0_i32_0, %c0_i32_1 : i32, i32, i32
  }
  func.func @transform_6(%arg0: i32) -> (i32, i32, i32) {
    %c0_i32 = arith.constant 0 : i32
    %c0_i32_0 = arith.constant 0 : i32
    %c0_i32_1 = arith.constant 0 : i32
    %c0_i32_2 = arith.constant 0 : i32
    return %c0_i32, %c0_i32_0, %c0_i32_1 : i32, i32, i32
  }
  func.func @transform_7(%arg0: i32) -> (i32, i32, i32) {
    %c0_i32 = arith.constant 0 : i32
    %c0_i32_0 = arith.constant 0 : i32
    %c0_i32_1 = arith.constant 0 : i32
    %c0_i32_2 = arith.constant 0 : i32
    return %c0_i32, %c0_i32_0, %c0_i32_1 : i32, i32, i32
  }
}

</mosaic_0001>

<bundles_post_ra>
// kernel: stacked_lstm_forward.1
= control target key start
LH: loop header
LB: loop body
LE: loop exit
PB: predicated region body
PF: predicated region fallthrough
CT: control target
= control target key end

     0   :  { %13 = vsyncpa [#allocation3], 0  ;;  %s2779_s0 = inlined_call_operand.vmem [shape: f32[8,128], index: 0, kind: input, shape index: {}]   ;;  %s2780_s1 = inlined_call_operand.hbm [shape: bf16[128,512], index: 1, kind: input, shape index: {}]   ;;  %s2781_s2 = inlined_call_operand.hbm [shape: f32[3,8,128], index: 2, kind: input, shape index: {}]   ;;  %s2782_s3 = inlined_call_operand.vmem [shape: f32[3,8,128], index: 3, kind: input, shape index: {}]   ;;  %s2783_s4 = inlined_call_operand.hbm [shape: bf16[3,256,512], index: 4, kind: input, shape index: {}]   ;;  %s2784_s5 = inlined_call_operand.hbm [shape: f32[3,1,512], index: 5, kind: input, shape index: {}]   ;;  %s2785_s6 = inlined_call_operand.vmem [shape: f32[3,8,128], index: 6, kind: output, shape index: {0}]   ;;  %s2786_s7 = inlined_call_operand.hbm [shape: f32[3,8,128], index: 7, kind: output, shape index: {1}]  }
   0x1   :  { %14 = vsyncpa [#allocation6], 0 }
   0x2   :  { %15 = vsyncpa [#allocation9], 0 }
   0x3   :  { %16 = vsyncpa [#allocation4], 0  ;;  %s2601_s24 = smov [#allocation5]   ;;  %s2483_s28 = scalar_lea.hbm %s2781_s2, 384 }
   0x4   :  { %s36_s25 = sshll.u32 %s2601_s24, 4  ;;  %p2484_p0 = scmp.ne.s32.totalorder %s2781_s2, %s2483_s28  ;;  %s37_s25 = int_to_ptr.vmem [resolvable:$true] %s36_s25 }
   0x5   :  { %p2487_p1 = scmp.lt.u32.totalorder %s2483_s28, %s2781_s2 }
   0x7   :  { %p2489_p2 = pnand %p2487_p1, %p2484_p0 }
   0x9   :  { %2492 = shalt.err (!%p2489_p2)
}
   0xa   :  { %s2493_s10 = scalar_lea.vmem %s37_s25, 384  ;;  %p2498_p4 = scmp.lt.s32.totalorder %s37_s25, %s37_s25 }
   0xb   :  { %p2494_p3 = scmp.ne.s32.totalorder %s37_s25, %s2493_s10  ;;  %p2499_p5 = scmp.lt.s32.totalorder %s2493_s10, %s2493_s10 }
   0xd   :  { %p2500_p6 = por %p2499_p5, %p2498_p4 }
   0xf   :  { %p2501_p7 = pnand %p2500_p6, %p2494_p3 }
  0x11   :  { %2504 = shalt.err (!%p2501_p7)
}
  0x12   :  { %s2602_s11 = smov 128   ;;  %s2603_s12 = smov 8  }
  0x13   :  { %42 = dma.hbm_to_vmem [thread:$0]  %s2781_s2, 384, %s37_s25, [#allocation6], %s2602_s11, %s2602_s11, %s2603_s12  }
  0x14   :  { %s2604_s15 = smov [#allocation2]   ;;  %s2505_s19 = scalar_lea.hbm %s2780_s1, 4096 }
  0x15   :  { %s24_s16 = sshll.u32 %s2604_s15, 4  ;;  %p2506_p8 = scmp.ne.s32.totalorder %s2780_s1, %s2505_s19  ;;  %s25_s16 = int_to_ptr.vmem [resolvable:$true] %s24_s16 }
  0x16   :  { %p2509_p9 = scmp.lt.u32.totalorder %s2505_s19, %s2780_s1 }
  0x18   :  { %p2511_p10 = pnand %p2509_p9, %p2506_p8 }
  0x1a   :  { %2514 = shalt.err (!%p2511_p10)
}
  0x1b   :  { %s2515_s24 = scalar_lea.vmem %s25_s16, 4096  ;;  %p2520_p12 = scmp.lt.s32.totalorder %s25_s16, %s25_s16 }
  0x1c   :  { %p2516_p11 = scmp.ne.s32.totalorder %s25_s16, %s2515_s24  ;;  %p2521_p13 = scmp.lt.s32.totalorder %s2515_s24, %s2515_s24 }
  0x1e   :  { %p2522_p0 = por %p2521_p13, %p2520_p12 }
  0x20   :  { %p2523_p1 = pnand %p2522_p0, %p2516_p11 }
  0x22   :  { %2526 = shalt.err (!%p2523_p1)
}
  0x23   :  { %s2605_s2 = smov 256   ;;  %s2606_s25 = smov 16  }
  0x24   :  { %30 = dma.hbm_to_vmem [thread:$0]  %s2780_s1, 4096, %s25_s16, [#allocation3], %s2605_s2, %s2605_s2, %s2606_s25  }
  0x25   :  { %s2607_s28 = smov [#allocation7]   ;;  %s2608_s30 = smov [#allocation8]  }
  0x26   :  { %s50_s29 = sshll.u32 %s2607_s28, 4  ;;  %s62_s8 = sshll.u32 %s2608_s30, 4  ;;  %s51_s29 = int_to_ptr.vmem [resolvable:$true] %s50_s29  ;;  %s2680_s8 = int_to_ptr.vmem [resolvable:$true] %s62_s8 }
  0x27   :  { %s2527_s13 = scalar_lea.hbm %s2783_s4, 24576 }
  0x28   :  { %p2528_p2 = scmp.ne.s32.totalorder %s2783_s4, %s2527_s13  ;;  %p2531_p3 = scmp.lt.u32.totalorder %s2527_s13, %s2783_s4 }
  0x2a   :  { %p2533_p4 = pnand %p2531_p3, %p2528_p2 }
  0x2c   :  { %2536 = shalt.err (!%p2533_p4)
}
  0x2d   :  { %s2537_s1 = scalar_lea.vmem %s51_s29, 24576  ;;  %p2542_p6 = scmp.lt.s32.totalorder %s51_s29, %s51_s29 }
  0x2e   :  { %p2538_p5 = scmp.ne.s32.totalorder %s51_s29, %s2537_s1  ;;  %p2543_p7 = scmp.lt.s32.totalorder %s2537_s1, %s2537_s1 }
  0x30   :  { %p2544_p8 = por %p2543_p7, %p2542_p6 }
  0x32   :  { %p2545_p9 = pnand %p2544_p8, %p2538_p5 }
  0x34   :  { %2548 = shalt.err (!%p2545_p9)
}
  0x35   :  { %56 = dma.hbm_to_vmem [thread:$0]  %s2783_s4, 24576, %s51_s29, [#allocation6], %s2605_s2, %s2605_s2, %s2606_s25  }
  0x36   :  { %s2549_s22 = scalar_lea.hbm %s2784_s5, 192 }
  0x37   :  { %p2550_p10 = scmp.ne.s32.totalorder %s2784_s5, %s2549_s22  ;;  %p2553_p11 = scmp.lt.u32.totalorder %s2549_s22, %s2784_s5 }
  0x39   :  { %p2555_p12 = pnand %p2553_p11, %p2550_p10 }
  0x3b   :  { %2558 = shalt.err (!%p2555_p12)
}
  0x3c   :  { %s2559_s28 = scalar_lea.vmem %s2680_s8, 192  ;;  %p2564_p0 = scmp.lt.s32.totalorder %s2680_s8, %s2680_s8 }
  0x3d   :  { %p2560_p13 = scmp.ne.s32.totalorder %s2680_s8, %s2559_s28  ;;  %p2565_p1 = scmp.lt.s32.totalorder %s2559_s28, %s2559_s28 }
  0x3f   :  { %p2566_p2 = por %p2565_p1, %p2564_p0 }
  0x41   :  { %p2567_p3 = pnand %p2566_p2, %p2560_p13 }
  0x43   :  { %2570 = shalt.err (!%p2567_p3)
}
  0x44   :  { %s2609_s4 = smov 64   ;;  %s2610_s2 = smov 4  }
  0x45   :  { %68 = dma.hbm_to_vmem [thread:$0]  %s2784_s5, 192, %s2680_s8, [#allocation9], %s2609_s4, %s2609_s4, %s2610_s2  }
  0x46   :  { %2593 = dma.done.wait [#allocation3], 4096  }
  0x47   :  { %2594 = vsyncadd [#allocation3], 4294963200 }
  0x48   :  { %2595 = dma.done.wait [#allocation6], 24960  }
  0x49   :  { %2596 = vsyncadd [#allocation6], 4294942336 }
  0x4a   :  { %2597 = dma.done.wait [#allocation9], 192  }
  0x4b   :  { %2598 = vsyncadd [#allocation9], 4294967104  ;;  %v2611_v0 = vmov 0   ;;  %v2147_v1 = vld [vmem:[#allocation2 + $0x4] ss:$16 sps:$4 sm:$0xff]   ;;  %s2612_s16 = smov [#allocation10]  }
  0x4c   :  { %308 = vmatprep.mubr.bf16.mxu0 %v2611_v0  ;;  %349 = vmatprep.mubr.bf16.mxu1 %v2611_v0  ;;  %v2149_v2 = vld [vmem:[#allocation2 + $0xc] ss:$16 sps:$4 sm:$0xff]   ;;  %v2151_v3 = vld [vmem:[#allocation2] ss:$16 sps:$4 sm:$0xff]   ;;  %v2152_v4 = vld [vmem:[#allocation2 + $0x8] ss:$16 sps:$4 sm:$0xff]  }
  0x4d   :  { %276 = vmatprep.subr.bf16.mxu0 %v2147_v1  ;;  %317 = vmatprep.subr.bf16.mxu1 %v2149_v2  ;;  %v2153_v5 = vld [vmem:[#allocation2 + $0x24] ss:$16 sps:$4 sm:$0xff]   ;;  %v2155_v6 = vld [vmem:[#allocation2 + $0x2c] ss:$16 sps:$4 sm:$0xff]   ;;  %v2157_v7 = vld [vmem:[#allocation2 + $0x20] ss:$16 sps:$4 sm:$0xff]  }
  0x4e   :  { %277 = vmatpush1.bf16.msra.mxu0 %v2151_v3  ;;  %318 = vmatpush1.bf16.msra.mxu1 %v2152_v4  ;;  %v2158_v8 = vld [vmem:[#allocation2 + $0x28] ss:$16 sps:$4 sm:$0xff]   ;;  %v2159_v9 = vld [vmem:[#allocation2 + $0x44] ss:$16 sps:$4 sm:$0xff]   ;;  %v2161_v10 = vld [vmem:[#allocation2 + $0x4c] ss:$16 sps:$4 sm:$0xff]  }
  0x4f   :  { %278 = vmatprep.subr.bf16.mxu0 %v2153_v5  ;;  %319 = vmatprep.subr.bf16.mxu1 %v2155_v6  ;;  %v2163_v11 = vld [vmem:[#allocation2 + $0x40] ss:$16 sps:$4 sm:$0xff]   ;;  %v2164_v12 = vld [vmem:[#allocation2 + $0x48] ss:$16 sps:$4 sm:$0xff]   ;;  %v2165_v13 = vld [vmem:[#allocation2 + $0x64] ss:$16 sps:$4 sm:$0xff]  }
  0x50   :  { %v2167_v14 = vld [vmem:[#allocation2 + $0x6c] ss:$16 sps:$4 sm:$0xff]   ;;  %v2169_v15 = vld [vmem:[#allocation2 + $0x60] ss:$16 sps:$4 sm:$0xff]   ;;  %v2170_v16 = vld [vmem:[#allocation2 + $0x68] ss:$16 sps:$4 sm:$0xff]  }
  0x51   :  { %v2171_v17 = vld [vmem:[#allocation2 + $0x84] ss:$16 sps:$4 sm:$0xff]   ;;  %v2173_v18 = vld [vmem:[#allocation2 + $0x8c] ss:$16 sps:$4 sm:$0xff]   ;;  %v2175_v19 = vld [vmem:[#allocation2 + $0x80] ss:$16 sps:$4 sm:$0xff]  }
  0x52   :  { %279 = vmatpush1.bf16.msra.mxu0 %v2157_v7  ;;  %320 = vmatpush1.bf16.msra.mxu1 %v2158_v8  ;;  %v2176_v20 = vld [vmem:[#allocation2 + $0x88] ss:$16 sps:$4 sm:$0xff]   ;;  %v2177_v21 = vld [vmem:[#allocation2 + $0xa4] ss:$16 sps:$4 sm:$0xff]   ;;  %v2179_v22 = vld [vmem:[#allocation2 + $0xac] ss:$16 sps:$4 sm:$0xff]  }
  0x53   :  { %280 = vmatprep.subr.bf16.mxu0 %v2159_v9  ;;  %321 = vmatprep.subr.bf16.mxu1 %v2161_v10  ;;  %v2181_v23 = vld [vmem:[#allocation2 + $0xa0] ss:$16 sps:$4 sm:$0xff]   ;;  %v2182_v24 = vld [vmem:[#allocation2 + $0xa8] ss:$16 sps:$4 sm:$0xff]   ;;  %v2183_v25 = vld [vmem:[#allocation2 + $0xc4] ss:$16 sps:$4 sm:$0xff]  }
  0x54   :  { %v2185_v26 = vld [vmem:[#allocation2 + $0xcc] ss:$16 sps:$4 sm:$0xff]   ;;  %v2187_v27 = vld [vmem:[#allocation2 + $0xc0] ss:$16 sps:$4 sm:$0xff]   ;;  %v2188_v28 = vld [vmem:[#allocation2 + $0xc8] ss:$16 sps:$4 sm:$0xff]  }
  0x55   :  { %v2189_v29 = vld [vmem:[#allocation2 + $0xe4] ss:$16 sps:$4 sm:$0xff]   ;;  %v2191_v30 = vld [vmem:[#allocation2 + $0xec] ss:$16 sps:$4 sm:$0xff]   ;;  %v2193_v31 = vld [vmem:[#allocation2 + $0xe0] ss:$16 sps:$4 sm:$0xff]  }
  0x56   :  { %281 = vmatpush1.bf16.msra.mxu0 %v2163_v11  ;;  %322 = vmatpush1.bf16.msra.mxu1 %v2164_v12  ;;  %v2194_v32 = vld [vmem:[#allocation2 + $0xe8] ss:$16 sps:$4 sm:$0xff]   ;;  %v82_v33 = vld [vmem:[%s2779_s0] sm:$0xff]  ;;  %v2197_v34 = vld [vmem:[#allocation7 + $0x104] ss:$16 sps:$4 sm:$0xff]   ;;  %s1914_s19 = sshll.u32 %s2612_s16, 4  ;;  %s1915_s19 = int_to_ptr.vmem [resolvable:$true] %s1914_s19 }
  0x57   :  { %282 = vmatprep.subr.bf16.mxu0 %v2165_v13  ;;  %323 = vmatprep.subr.bf16.mxu1 %v2167_v14  ;;  %v2200_v35 = vld [vmem:[#allocation7 + $0x10c] ss:$16 sps:$4 sm:$0xff]   ;;  %v83_v36 = vpack.c.bf16 %v82_v33, %v82_v33  ;;  %v2195_v37 = vld [vmem:[#allocation7 + $0x100] ss:$16 sps:$4 sm:$0xff]   ;;  %v2198_v38 = vld [vmem:[#allocation7 + $0x108] ss:$16 sps:$4 sm:$0xff]   ;;  %p2576_p5 = scmp.lt.s32.totalorder %s1915_s19, %s1915_s19 }
  0x58   :  { %v2203_v39 = vld [vmem:[#allocation7 + $0x124] ss:$16 sps:$4 sm:$0xff]   ;;  %v2206_v40 = vld [vmem:[#allocation7 + $0x12c] ss:$16 sps:$4 sm:$0xff]   ;;  %v2201_v41 = vld [vmem:[#allocation7 + $0x120] ss:$16 sps:$4 sm:$0xff]  }
  0x59   :  { %v2204_v42 = vld [vmem:[#allocation7 + $0x128] ss:$16 sps:$4 sm:$0xff]   ;;  %v2209_v43 = vld [vmem:[#allocation7 + $0x144] ss:$16 sps:$4 sm:$0xff]   ;;  %v2212_v44 = vld [vmem:[#allocation7 + $0x14c] ss:$16 sps:$4 sm:$0xff]  }
  0x5a   :  { %283 = vmatpush1.bf16.msra.mxu0 %v2169_v15  ;;  %324 = vmatpush1.bf16.msra.mxu1 %v2170_v16  ;;  %v2207_v45 = vld [vmem:[#allocation7 + $0x140] ss:$16 sps:$4 sm:$0xff]   ;;  %v2210_v46 = vld [vmem:[#allocation7 + $0x148] ss:$16 sps:$4 sm:$0xff]   ;;  %v2215_v47 = vld [vmem:[#allocation7 + $0x164] ss:$16 sps:$4 sm:$0xff]  }
  0x5b   :  { %284 = vmatprep.subr.bf16.mxu0 %v2171_v17  ;;  %325 = vmatprep.subr.bf16.mxu1 %v2173_v18  ;;  %v2218_v48 = vld [vmem:[#allocation7 + $0x16c] ss:$16 sps:$4 sm:$0xff]   ;;  %v2213_v49 = vld [vmem:[#allocation7 + $0x160] ss:$16 sps:$4 sm:$0xff]   ;;  %v2216_v50 = vld [vmem:[#allocation7 + $0x168] ss:$16 sps:$4 sm:$0xff]  }
  0x5c   :  { %v2221_v51 = vld [vmem:[#allocation7 + $0x184] ss:$16 sps:$4 sm:$0xff]   ;;  %v2224_v52 = vld [vmem:[#allocation7 + $0x18c] ss:$16 sps:$4 sm:$0xff]   ;;  %v2219_v53 = vld [vmem:[#allocation7 + $0x180] ss:$16 sps:$4 sm:$0xff]  }
  0x5d   :  { %v2222_v54 = vld [vmem:[#allocation7 + $0x188] ss:$16 sps:$4 sm:$0xff]   ;;  %v2227_v55 = vld [vmem:[#allocation7 + $0x1a4] ss:$16 sps:$4 sm:$0xff]   ;;  %v2230_v56 = vld [vmem:[#allocation7 + $0x1ac] ss:$16 sps:$4 sm:$0xff]  }
  0x5e   :  { %285 = vmatpush1.bf16.msra.mxu0 %v2175_v19  ;;  %326 = vmatpush1.bf16.msra.mxu1 %v2176_v20  ;;  %v2225_v57 = vld [vmem:[#allocation7 + $0x1a0] ss:$16 sps:$4 sm:$0xff]   ;;  %v2228_v58 = vld [vmem:[#allocation7 + $0x1a8] ss:$16 sps:$4 sm:$0xff]   ;;  %v2233_v59 = vld [vmem:[#allocation7 + $0x1c4] ss:$16 sps:$4 sm:$0xff]  }
  0x5f   :  { %286 = vmatprep.subr.bf16.mxu0 %v2177_v21  ;;  %327 = vmatprep.subr.bf16.mxu1 %v2179_v22  ;;  %v2236_v60 = vld [vmem:[#allocation7 + $0x1cc] ss:$16 sps:$4 sm:$0xff]   ;;  %v2231_v61 = vld [vmem:[#allocation7 + $0x1c0] ss:$16 sps:$4 sm:$0xff]   ;;  %v2234_v62 = vld [vmem:[#allocation7 + $0x1c8] ss:$16 sps:$4 sm:$0xff]  }
  0x60   :  { %v2239_v63 = vld [vmem:[#allocation7 + $0x1e4] ss:$16 sps:$4 sm:$0xff]   ;;  %v2242_v1 = vld [vmem:[#allocation7 + $0x1ec] ss:$16 sps:$4 sm:$0xff]   ;;  %v2237_v2 = vld [vmem:[#allocation7 + $0x1e0] ss:$16 sps:$4 sm:$0xff]  }
  0x61   :  { %v2240_v3 = vld [vmem:[#allocation7 + $0x1e8] ss:$16 sps:$4 sm:$0xff]   ;;  %v2245_v6 = vld [vmem:[#allocation7 + $0x204] ss:$16 sps:$4 sm:$0xff]   ;;  %v2248_v7 = vld [vmem:[#allocation7 + $0x20c] ss:$16 sps:$4 sm:$0xff]  }
  0x62   :  { %287 = vmatpush1.bf16.msra.mxu0 %v2181_v23  ;;  %328 = vmatpush1.bf16.msra.mxu1 %v2182_v24  ;;  %v390_v4 = vld [vmem:[#allocation5] sm:$0xff]  ;;  %v2243_v8 = vld [vmem:[#allocation7 + $0x200] ss:$16 sps:$4 sm:$0xff]   ;;  %v2251_v10 = vld [vmem:[#allocation7 + $0x224] ss:$16 sps:$4 sm:$0xff]   ;;  %s2571_s20 = scalar_lea.vmem %s1915_s19, 384 }
  0x63   :  { %288 = vmatprep.subr.bf16.mxu0 %v2183_v25  ;;  %329 = vmatprep.subr.bf16.mxu1 %v2185_v26  ;;  %v391_v5 = vpack.c.bf16 %v390_v4, %v390_v4  ;;  %v2246_v9 = vld [vmem:[#allocation7 + $0x208] ss:$16 sps:$4 sm:$0xff]   ;;  %v2254_v11 = vld [vmem:[#allocation7 + $0x22c] ss:$16 sps:$4 sm:$0xff]   ;;  %v2249_v12 = vld [vmem:[#allocation7 + $0x220] ss:$16 sps:$4 sm:$0xff]   ;;  %p2572_p4 = scmp.ne.s32.totalorder %s1915_s19, %s2571_s20  ;;  %p2577_p6 = scmp.lt.s32.totalorder %s2571_s20, %s2571_s20 }
  0x64   :  { %v2252_v13 = vld [vmem:[#allocation7 + $0x228] ss:$16 sps:$4 sm:$0xff]   ;;  %v2257_v14 = vld [vmem:[#allocation7 + $0x244] ss:$16 sps:$4 sm:$0xff]   ;;  %v2260_v15 = vld [vmem:[#allocation7 + $0x24c] ss:$16 sps:$4 sm:$0xff]  }
  0x65   :  { %v2255_v16 = vld [vmem:[#allocation7 + $0x240] ss:$16 sps:$4 sm:$0xff]   ;;  %v2258_v17 = vld [vmem:[#allocation7 + $0x248] ss:$16 sps:$4 sm:$0xff]   ;;  %v2263_v18 = vld [vmem:[#allocation7 + $0x264] ss:$16 sps:$4 sm:$0xff]   ;;  %p2578_p7 = por %p2577_p6, %p2576_p5 }
  0x66   :  { %289 = vmatpush1.bf16.msra.mxu0 %v2187_v27  ;;  %330 = vmatpush1.bf16.msra.mxu1 %v2188_v28  ;;  %v2266_v19 = vld [vmem:[#allocation7 + $0x26c] ss:$16 sps:$4 sm:$0xff]   ;;  %v2261_v20 = vld [vmem:[#allocation7 + $0x260] ss:$16 sps:$4 sm:$0xff]   ;;  %v2264_v21 = vld [vmem:[#allocation7 + $0x268] ss:$16 sps:$4 sm:$0xff]  }
  0x67   :  { %290 = vmatprep.subr.bf16.mxu0 %v2189_v29  ;;  %331 = vmatprep.subr.bf16.mxu1 %v2191_v30  ;;  %v2269_v22 = vld [vmem:[#allocation7 + $0x284] ss:$16 sps:$4 sm:$0xff]   ;;  %v2272_v23 = vld [vmem:[#allocation7 + $0x28c] ss:$16 sps:$4 sm:$0xff]   ;;  %v2267_v24 = vld [vmem:[#allocation7 + $0x280] ss:$16 sps:$4 sm:$0xff]   ;;  %p2579_p8 = pnand %p2578_p7, %p2572_p4 }
  0x68   :  { %v2270_v25 = vld [vmem:[#allocation7 + $0x288] ss:$16 sps:$4 sm:$0xff]   ;;  %v2273_v26 = vld [vmem:[#allocation7 + $0x2a0] ss:$16 sps:$4 sm:$0xff]   ;;  %v2275_v27 = vld [vmem:[#allocation7 + $0x2a4] ss:$16 sps:$4 sm:$0xff]  }
  0x69   :  { %v2276_v28 = vld [vmem:[#allocation7 + $0x2a8] ss:$16 sps:$4 sm:$0xff]   ;;  %v2278_v29 = vld [vmem:[#allocation7 + $0x2ac] ss:$16 sps:$4 sm:$0xff]   ;;  %v2281_v30 = vld [vmem:[#allocation7 + $0x2c4] ss:$16 sps:$4 sm:$0xff]  }
  0x6a   :  { %291 = vmatpush1.bf16.msra.mxu0 %v2193_v31  ;;  %332 = vmatpush1.bf16.msra.mxu1 %v2194_v32  ;;  %v2284_v31 = vld [vmem:[#allocation7 + $0x2cc] ss:$16 sps:$4 sm:$0xff]   ;;  %v2279_v32 = vld [vmem:[#allocation7 + $0x2c0] ss:$16 sps:$4 sm:$0xff]   ;;  %v2282_v33 = vld [vmem:[#allocation7 + $0x2c8] ss:$16 sps:$4 sm:$0xff]  }
  0x6b   :  { %552 = vmatprep.subr.bf16.mxu0 %v2197_v34  ;;  %593 = vmatprep.subr.bf16.mxu1 %v2200_v35  ;;  %v2287_v34 = vld [vmem:[#allocation7 + $0x2e4] ss:$16 sps:$4 sm:$0xff]   ;;  %v2290_v35 = vld [vmem:[#allocation7 + $0x2ec] ss:$16 sps:$4 sm:$0xff]  }
  0x6d   :  { %309 = vmatmul.mubr.bf16.vlgmr.msra.gmra.mrb[0].mxu0 %v83_v36  ;;  %350 = vmatmul.mubr.bf16.vlgmr.msra.gmra.mrb[0].mxu1 %v83_v36  ;;  %v2285_v36 = vld [vmem:[#allocation7 + $0x2e0] ss:$16 sps:$4 sm:$0xff]  }
  0x6e   :  { %553 = vmatpush1.bf16.msra.mxu0 %v2195_v37  ;;  %594 = vmatpush1.bf16.msra.mxu1 %v2198_v38  ;;  %v2288_v37 = vld [vmem:[#allocation7 + $0x2e8] ss:$16 sps:$4 sm:$0xff]   ;;  %v2293_v38 = vld [vmem:[#allocation7 + $0x304] ss:$16 sps:$4 sm:$0xff]  }
  0x6f   :  { %554 = vmatprep.subr.bf16.mxu0 %v2203_v39  ;;  %595 = vmatprep.subr.bf16.mxu1 %v2206_v40  ;;  %v2296_v39 = vld [vmem:[#allocation7 + $0x30c] ss:$16 sps:$4 sm:$0xff]  }
  0x70   :  { %584 = vmatprep.mubr.bf16.mxu0 %v2611_v0  ;;  %625 = vmatprep.mubr.bf16.mxu1 %v2611_v0 }
  0x72   :  { %555 = vmatpush1.bf16.msra.mxu0 %v2201_v41  ;;  %596 = vmatpush1.bf16.msra.mxu1 %v2204_v42 }
  0x73   :  { %556 = vmatprep.subr.bf16.mxu0 %v2209_v43  ;;  %597 = vmatprep.subr.bf16.mxu1 %v2212_v44 }
  0x76   :  { %557 = vmatpush1.bf16.msra.mxu0 %v2207_v45  ;;  %598 = vmatpush1.bf16.msra.mxu1 %v2210_v46 }
  0x77   :  { %558 = vmatprep.subr.bf16.mxu0 %v2215_v47  ;;  %599 = vmatprep.subr.bf16.mxu1 %v2218_v48  ;;  %v636_v48 = vlaneseq }
  0x7a   :  { %559 = vmatpush1.bf16.msra.mxu0 %v2213_v49  ;;  %600 = vmatpush1.bf16.msra.mxu1 %v2216_v50  ;;  %v637_v49 = vshrl.u32 %v636_v48, 7  ;;  %v2315_v48 = vld [vmem:[#allocation7 + $0x380] ss:$16 sps:$4 sm:$0xff]  }
  0x7b   :  { %560 = vmatprep.subr.bf16.mxu0 %v2221_v51  ;;  %601 = vmatprep.subr.bf16.mxu1 %v2224_v52  ;;  %v634_v51 = vld [vmem:[#allocation8] sm:$0xf] }
  0x7c   :  { %v2720_v50 = vsub.s32 0, %v637_v49  ;;  %v2722_v52 = vsub.s32 1, %v637_v49 }
  0x7e   :  { %561 = vmatpush1.bf16.msra.mxu0 %v2219_v53  ;;  %602 = vmatpush1.bf16.msra.mxu1 %v2222_v54  ;;  %v639_v53 = vrot.slane %v634_v51, %v2720_v50 }
  0x7f   :  { %562 = vmatprep.subr.bf16.mxu0 %v2227_v55  ;;  %603 = vmatprep.subr.bf16.mxu1 %v2230_v56  ;;  %v643_v56 = vrot.slane %v634_v51, %v2722_v52 }
  0x82   :  { %563 = vmatpush1.bf16.msra.mxu0 %v2225_v57  ;;  %604 = vmatpush1.bf16.msra.mxu1 %v2228_v58 }
  0x83   :  { %564 = vmatprep.subr.bf16.mxu0 %v2233_v59  ;;  %605 = vmatprep.subr.bf16.mxu1 %v2236_v60 }
  0x86   :  { %565 = vmatpush1.bf16.msra.mxu0 %v2231_v61  ;;  %606 = vmatpush1.bf16.msra.mxu1 %v2234_v62 }
  0x87   :  { %566 = vmatprep.subr.bf16.mxu0 %v2239_v63  ;;  %607 = vmatprep.subr.bf16.mxu1 %v2242_v1 }
  0x8a   :  { %567 = vmatpush1.bf16.msra.mxu0 %v2237_v2  ;;  %608 = vmatpush1.bf16.msra.mxu1 %v2240_v3  ;;  %v2726_v3 = vsub.s32 2, %v637_v49 }
  0x8b   :  { %916 = vmatprep.subr.bf16.mxu0 %v2245_v6  ;;  %957 = vmatprep.subr.bf16.mxu1 %v2248_v7 }
  0x8d   :  { %585 = vmatmul.mubr.bf16.vlgmr.msra.gmra.mrb[4].mxu0 %v391_v5  ;;  %626 = vmatmul.mubr.bf16.vlgmr.msra.gmra.mrb[4].mxu1 %v391_v5 }
  0x8e   :  { %948 = vmatprep.mubr.bf16.mxu0 %v2611_v0  ;;  %989 = vmatprep.mubr.bf16.mxu1 %v2611_v0 }
  0x8f   :  { %917 = vmatpush1.bf16.msra.mxu0 %v2243_v8  ;;  %958 = vmatpush1.bf16.msra.mxu1 %v2246_v9  ;;  %v2728_v9 = vsub.s32 3, %v637_v49  ;;  %v2318_v49 = vld [vmem:[#allocation7 + $0x388] ss:$16 sps:$4 sm:$0xff]  }
  0x90   :  { %918 = vmatprep.subr.bf16.mxu0 %v2251_v10  ;;  %959 = vmatprep.subr.bf16.mxu1 %v2254_v11  ;;  %v647_v10 = vrot.slane %v634_v51, %v2726_v3 }
  0x91   :  { %v651_v11 = vrot.slane %v634_v51, %v2728_v9  ;;  %v2323_v51 = vld [vmem:[#allocation7 + $0x3a4] ss:$16 sps:$4 sm:$0xff]  }
  0x93   :  { %919 = vmatpush1.bf16.msra.mxu0 %v2249_v12  ;;  %960 = vmatpush1.bf16.msra.mxu1 %v2252_v13 }
  0x94   :  { %920 = vmatprep.subr.bf16.mxu0 %v2257_v14  ;;  %961 = vmatprep.subr.bf16.mxu1 %v2260_v15 }
  0x97   :  { %921 = vmatpush1.bf16.msra.mxu0 %v2255_v16  ;;  %962 = vmatpush1.bf16.msra.mxu1 %v2258_v17 }
  0x98   :  { %922 = vmatprep.subr.bf16.mxu0 %v2263_v18  ;;  %963 = vmatprep.subr.bf16.mxu1 %v2266_v19 }
  0x9b   :  { %923 = vmatpush1.bf16.msra.mxu0 %v2261_v20  ;;  %964 = vmatpush1.bf16.msra.mxu1 %v2264_v21 }
  0x9c   :  { %924 = vmatprep.subr.bf16.mxu0 %v2269_v22  ;;  %965 = vmatprep.subr.bf16.mxu1 %v2272_v23  ;;  %v660_v22 = vld [vmem:[%s2782_s3] sm:$0xff] }
  0x9f   :  { %925 = vmatpush1.bf16.msra.mxu0 %v2267_v24  ;;  %966 = vmatpush1.bf16.msra.mxu1 %v2270_v25 }
  0xa0   :  { %926 = vmatprep.subr.bf16.mxu0 %v2275_v27  ;;  %967 = vmatprep.subr.bf16.mxu1 %v2278_v29 }
  0xa3   :  { %927 = vmatpush1.bf16.msra.mxu0 %v2273_v26  ;;  %968 = vmatpush1.bf16.msra.mxu1 %v2276_v28 }
  0xa4   :  { %928 = vmatprep.subr.bf16.mxu0 %v2281_v30  ;;  %969 = vmatprep.subr.bf16.mxu1 %v2284_v31  ;;  %v2291_v31 = vld [vmem:[#allocation7 + $0x300] ss:$16 sps:$4 sm:$0xff]  }
  0xa7   :  { %929 = vmatpush1.bf16.msra.mxu0 %v2279_v32  ;;  %970 = vmatpush1.bf16.msra.mxu1 %v2282_v33  ;;  %v2294_v32 = vld [vmem:[#allocation7 + $0x308] ss:$16 sps:$4 sm:$0xff]  }
  0xa8   :  { %930 = vmatprep.subr.bf16.mxu0 %v2287_v34  ;;  %971 = vmatprep.subr.bf16.mxu1 %v2290_v35  ;;  %v2299_v34 = vld [vmem:[#allocation7 + $0x324] ss:$16 sps:$4 sm:$0xff]   ;;  %v2302_v35 = vld [vmem:[#allocation7 + $0x32c] ss:$16 sps:$4 sm:$0xff]  }
  0xab   :  { %931 = vmatpush1.bf16.msra.mxu0 %v2285_v36  ;;  %972 = vmatpush1.bf16.msra.mxu1 %v2288_v37  ;;  %v2297_v36 = vld [vmem:[#allocation7 + $0x320] ss:$16 sps:$4 sm:$0xff]   ;;  %v2300_v37 = vld [vmem:[#allocation7 + $0x328] ss:$16 sps:$4 sm:$0xff]  }
  0xac   :  { %1158 = vmatprep.subr.bf16.mxu0 %v2293_v38  ;;  %1199 = vmatprep.subr.bf16.mxu1 %v2296_v39  ;;  %v2305_v38 = vld [vmem:[#allocation7 + $0x344] ss:$16 sps:$4 sm:$0xff]   ;;  %v2308_v39 = vld [vmem:[#allocation7 + $0x34c] ss:$16 sps:$4 sm:$0xff]  }
 0x140   :  { %v310_v40 = vpop.f32.mrb[0].mxu0  ;;  %v351_v41 = vpop.f32.mrb[0].mxu1 }
 0x141   :  { %v312_v42 = vpop.f32.mrb[1].mxu0  ;;  %v353_v43 = vpop.f32.mrb[1].mxu1 }
 0x142   :  { %v314_v44 = vpop.f32.mrb[2].mxu0  ;;  %v355_v45 = vpop.f32.mrb[2].mxu1 }
 0x143   :  { %v315_v46 = vpop.f32.mrb[3].mxu0  ;;  %v356_v47 = vpop.f32.mrb[3].mxu1  ;;  %v2309_v44 = vld [vmem:[#allocation7 + $0x360] ss:$16 sps:$4 sm:$0xff]   ;;  %v2312_v45 = vld [vmem:[#allocation7 + $0x368] ss:$16 sps:$4 sm:$0xff]  }
 0x144   :  { %v2317_v46 = vld [vmem:[#allocation7 + $0x384] ss:$16 sps:$4 sm:$0xff]   ;;  %v2320_v47 = vld [vmem:[#allocation7 + $0x38c] ss:$16 sps:$4 sm:$0xff]  }
 0x160   :  { %v586_v54 = vpop.f32.mrb[4].mxu0  ;;  %v627_v55 = vpop.f32.mrb[4].mxu1 }
 0x161   :  { %v587_v57 = vadd.f32 %v586_v54, %v310_v40  ;;  %v628_v58 = vadd.f32 %v627_v55, %v351_v41  ;;  %v588_v59 = vpop.f32.mrb[5].mxu0  ;;  %v629_v60 = vpop.f32.mrb[5].mxu1  ;;  %v2303_v40 = vld [vmem:[#allocation7 + $0x340] ss:$16 sps:$4 sm:$0xff]   ;;  %v2306_v41 = vld [vmem:[#allocation7 + $0x348] ss:$16 sps:$4 sm:$0xff]  }
 0x162   :  { %v589_v61 = vadd.f32 %v588_v59, %v312_v42  ;;  %v630_v62 = vadd.f32 %v629_v60, %v353_v43  ;;  %v590_v63 = vpop.f32.mrb[6].mxu0  ;;  %v631_v1 = vpop.f32.mrb[6].mxu1  ;;  %v2311_v42 = vld [vmem:[#allocation7 + $0x364] ss:$16 sps:$4 sm:$0xff]   ;;  %v2314_v43 = vld [vmem:[#allocation7 + $0x36c] ss:$16 sps:$4 sm:$0xff]  }
 0x163   :  { %v656_v2 = vadd.f32 %v639_v53, %v587_v57  ;;  %v591_v4 = vpop.f32.mrb[7].mxu0  ;;  %v632_v5 = vpop.f32.mrb[7].mxu1  ;;  %v658_v12 = vadd.f32 %v647_v10, %v628_v58  ;;  %v2326_v53 = vld [vmem:[#allocation7 + $0x3ac] ss:$16 sps:$4 sm:$0xff]   ;;  %v2321_v54 = vld [vmem:[#allocation7 + $0x3a0] ss:$16 sps:$4 sm:$0xff]  }
 0x164   :  { %v657_v6 = vadd.f32 %v643_v56, %v589_v61  ;;  %v659_v13 = vadd.f32 %v651_v11, %v630_v62  ;;  %v2324_v55 = vld [vmem:[#allocation7 + $0x3a8] ss:$16 sps:$4 sm:$0xff]   ;;  %v2329_v56 = vld [vmem:[#allocation7 + $0x3c4] ss:$16 sps:$4 sm:$0xff]   ;;  %v2332_v57 = vld [vmem:[#allocation7 + $0x3cc] ss:$16 sps:$4 sm:$0xff]  }
 0x165   :  { %v1994_v7 = vmul.f32 -1.442695, %v656_v2  ;;  %v1996_v14 = vmul.f32 -1.442695, %v658_v12  ;;  %v2327_v58 = vld [vmem:[#allocation7 + $0x3c0] ss:$16 sps:$4 sm:$0xff]  }
 0x166   :  { %v1995_v8 = vmul.f32 -1.442695, %v657_v6  ;;  %v2330_v59 = vld [vmem:[#allocation7 + $0x3c8] ss:$16 sps:$4 sm:$0xff]   ;;  %v2335_v60 = vld [vmem:[#allocation7 + $0x3e4] ss:$16 sps:$4 sm:$0xff]  }
 0x167   :  { %2435 = vpow2.f32 %v1994_v7  ;;  %v2338_v61 = vld [vmem:[#allocation7 + $0x3ec] ss:$16 sps:$4 sm:$0xff]   ;;  %v2333_v62 = vld [vmem:[#allocation7 + $0x3e0] ss:$16 sps:$4 sm:$0xff]   ;;  %v2336_v63 = vld [vmem:[#allocation7 + $0x3e8] ss:$16 sps:$4 sm:$0xff]  }
 0x168   :  { %2437 = vpow2.f32 %v1995_v8  ;;  %v754_v1 = vld [vmem:[#allocation5 + $0x8] sm:$0xff]  ;;  %v2344_v5 = vld [vmem:[#allocation7 + $0x40c] ss:$16 sps:$4 sm:$0xff]   ;;  %v2342_v7 = vld [vmem:[#allocation7 + $0x408] ss:$16 sps:$4 sm:$0xff]  }
 0x169   :  { %2439 = vtanh.f32 %v659_v13  ;;  %v755_v2 = vpack.c.bf16 %v754_v1, %v754_v1  ;;  %v2341_v4 = vld [vmem:[#allocation7 + $0x404] ss:$16 sps:$4 sm:$0xff]   ;;  %v2339_v6 = vld [vmem:[#allocation7 + $0x400] ss:$16 sps:$4 sm:$0xff]   ;;  %v2350_v10 = vld [vmem:[#allocation7 + $0x42c] ss:$16 sps:$4 sm:$0xff]  }
 0x16a   :  { %2441 = vpow2.f32 %v1996_v14  ;;  %v2347_v8 = vld [vmem:[#allocation7 + $0x424] ss:$16 sps:$4 sm:$0xff]   ;;  %v2345_v11 = vld [vmem:[#allocation7 + $0x420] ss:$16 sps:$4 sm:$0xff]   ;;  %v2348_v12 = vld [vmem:[#allocation7 + $0x428] ss:$16 sps:$4 sm:$0xff]  }
 0x16b   :  { %v2353_v13 = vld [vmem:[#allocation7 + $0x444] ss:$16 sps:$4 sm:$0xff]   ;;  %v2356_v14 = vld [vmem:[#allocation7 + $0x44c] ss:$16 sps:$4 sm:$0xff]  }
 0x171   :  { %v2436_v15 = vpop.eup %2435 }
 0x172   :  { %v670_v16 = vadd.f32 1.0, %v2436_v15  ;;  %v2438_v17 = vpop.eup %2437  ;;  %v2351_v15 = vld [vmem:[#allocation7 + $0x440] ss:$16 sps:$4 sm:$0xff]  }
 0x173   :  { %v671_v18 = vadd.f32 1.0, %v2438_v17  ;;  %v2440_v19 = vpop.eup %2439  ;;  %v2359_v17 = vld [vmem:[#allocation7 + $0x464] ss:$16 sps:$4 sm:$0xff]  }
 0x174   :  { %2443 = vrcp.f32 %v670_v16  ;;  %v2442_v20 = vpop.eup %2441  ;;  %v2354_v16 = vld [vmem:[#allocation7 + $0x448] ss:$16 sps:$4 sm:$0xff]  }
 0x175   :  { %2445 = vrcp.f32 %v671_v18  ;;  %v672_v25 = vadd.f32 1.0, %v2442_v20  ;;  %v2362_v18 = vld [vmem:[#allocation7 + $0x46c] ss:$16 sps:$4 sm:$0xff]   ;;  %v2360_v20 = vld [vmem:[#allocation7 + $0x468] ss:$16 sps:$4 sm:$0xff]  }
 0x177   :  { %2447 = vrcp.f32 %v672_v25  ;;  %v2369_v25 = vld [vmem:[#allocation7 + $0x4a0] ss:$16 sps:$4 sm:$0xff]  }
 0x17e   :  { %v2444_v21 = vpop.eup %2443 }
 0x17f   :  { %v681_v23 = vmul.f32 %v2444_v21, %v2440_v19  ;;  %v2446_v24 = vpop.eup %2445  ;;  %v2357_v19 = vld [vmem:[#allocation7 + $0x460] ss:$16 sps:$4 sm:$0xff]   ;;  %v2365_v21 = vld [vmem:[#allocation7 + $0x484] ss:$16 sps:$4 sm:$0xff]  }
 0x180   :  { %v680_v26 = vmul.f32 %v2446_v24, %v660_v22  ;;  %v2368_v22 = vld [vmem:[#allocation7 + $0x48c] ss:$16 sps:$4 sm:$0xff]   ;;  %v2366_v24 = vld [vmem:[#allocation7 + $0x488] ss:$16 sps:$4 sm:$0xff]  }
 0x181   :  { %v2448_v28 = vpop.eup %2447 }
 0x182   :  { %v682_v27 = vadd.f32 %v681_v23, %v680_v26  ;;  %v2363_v23 = vld [vmem:[#allocation7 + $0x480] ss:$16 sps:$4 sm:$0xff]   ;;  %v2371_v26 = vld [vmem:[#allocation7 + $0x4a4] ss:$16 sps:$4 sm:$0xff]  }
 0x184   :  { %2449 = vtanh.f32 %v682_v27  ;;  %686 = vst [vmem:[#allocation10] sm:$0xff] %v682_v27  ;;  %v2372_v27 = vld [vmem:[#allocation7 + $0x4a8] ss:$16 sps:$4 sm:$0xff]  }
 0x18e   :  { %v2450_v29 = vpop.eup %2449 }
 0x18f   :  { %v684_v30 = vmul.f32 %v2450_v29, %v2448_v28  ;;  %v2374_v28 = vld [vmem:[#allocation7 + $0x4ac] ss:$16 sps:$4 sm:$0xff]   ;;  %v2377_v29 = vld [vmem:[#allocation7 + $0x4c4] ss:$16 sps:$4 sm:$0xff]  }
 0x191   :  { %685 = vst [vmem:[%s2785_s6] sm:$0xff] %v684_v30  ;;  %v687_v33 = vpack.c.bf16 %v684_v30, %v684_v30  ;;  %v2380_v30 = vld [vmem:[#allocation7 + $0x4cc] ss:$16 sps:$4 sm:$0xff]  }
 0x193   :  { %949 = vmatmul.mubr.bf16.vlgmr.msra.gmra.mrb[8].mxu0 %v687_v33  ;;  %990 = vmatmul.mubr.bf16.vlgmr.msra.gmra.mrb[8].mxu1 %v687_v33  ;;  %v2383_v33 = vld [vmem:[#allocation7 + $0x4e4] ss:$16 sps:$4 sm:$0xff]  }
 0x194   :  { %1159 = vmatpush1.bf16.msra.mxu0 %v2291_v31  ;;  %1200 = vmatpush1.bf16.msra.mxu1 %v2294_v32  ;;  %v2375_v31 = vld [vmem:[#allocation7 + $0x4c0] ss:$16 sps:$4 sm:$0xff]   ;;  %v2378_v32 = vld [vmem:[#allocation7 + $0x4c8] ss:$16 sps:$4 sm:$0xff]  }
 0x195   :  { %1160 = vmatprep.subr.bf16.mxu0 %v2299_v34  ;;  %1201 = vmatprep.subr.bf16.mxu1 %v2302_v35  ;;  %v2386_v34 = vld [vmem:[#allocation7 + $0x4ec] ss:$16 sps:$4 sm:$0xff]   ;;  %v2381_v35 = vld [vmem:[#allocation7 + $0x4e0] ss:$16 sps:$4 sm:$0xff]  }
 0x196   :  { %1190 = vmatprep.mubr.bf16.mxu0 %v2611_v0  ;;  %1231 = vmatprep.mubr.bf16.mxu1 %v2611_v0 }
 0x198   :  { %1161 = vmatpush1.bf16.msra.mxu0 %v2297_v36  ;;  %1202 = vmatpush1.bf16.msra.mxu1 %v2300_v37  ;;  %v2384_v36 = vld [vmem:[#allocation7 + $0x4e8] ss:$16 sps:$4 sm:$0xff]   ;;  %v2389_v37 = vld [vmem:[#allocation7 + $0x504] ss:$16 sps:$4 sm:$0xff]  }
 0x199   :  { %1162 = vmatprep.subr.bf16.mxu0 %v2305_v38  ;;  %1203 = vmatprep.subr.bf16.mxu1 %v2308_v39  ;;  %v2392_v38 = vld [vmem:[#allocation7 + $0x50c] ss:$16 sps:$4 sm:$0xff]  }
 0x19c   :  { %1163 = vmatpush1.bf16.msra.mxu0 %v2303_v40  ;;  %1204 = vmatpush1.bf16.msra.mxu1 %v2306_v41 }
 0x19d   :  { %1164 = vmatprep.subr.bf16.mxu0 %v2311_v42  ;;  %1205 = vmatprep.subr.bf16.mxu1 %v2314_v43 }
 0x1a0   :  { %1165 = vmatpush1.bf16.msra.mxu0 %v2309_v44  ;;  %1206 = vmatpush1.bf16.msra.mxu1 %v2312_v45 }
 0x1a1   :  { %1166 = vmatprep.subr.bf16.mxu0 %v2317_v46  ;;  %1207 = vmatprep.subr.bf16.mxu1 %v2320_v47  ;;  %v1241_v47 = vld [vmem:[#allocation8 + $0x4] sm:$0xf] }
 0x1a4   :  { %1167 = vmatpush1.bf16.msra.mxu0 %v2315_v48  ;;  %1208 = vmatpush1.bf16.msra.mxu1 %v2318_v49  ;;  %v1246_v48 = vrot.slane %v1241_v47, %v2720_v50 }
 0x1a5   :  { %1168 = vmatprep.subr.bf16.mxu0 %v2323_v51  ;;  %1209 = vmatprep.subr.bf16.mxu1 %v2326_v53  ;;  %v1250_v53 = vrot.slane %v1241_v47, %v2722_v52 }
 0x1a8   :  { %1169 = vmatpush1.bf16.msra.mxu0 %v2321_v54  ;;  %1210 = vmatpush1.bf16.msra.mxu1 %v2324_v55 }
 0x1a9   :  { %1170 = vmatprep.subr.bf16.mxu0 %v2329_v56  ;;  %1211 = vmatprep.subr.bf16.mxu1 %v2332_v57 }
 0x1ac   :  { %1171 = vmatpush1.bf16.msra.mxu0 %v2327_v58  ;;  %1212 = vmatpush1.bf16.msra.mxu1 %v2330_v59 }
 0x1ad   :  { %1172 = vmatprep.subr.bf16.mxu0 %v2335_v60  ;;  %1213 = vmatprep.subr.bf16.mxu1 %v2338_v61 }
 0x1b0   :  { %1173 = vmatpush1.bf16.msra.mxu0 %v2333_v62  ;;  %1214 = vmatpush1.bf16.msra.mxu1 %v2336_v63 }
 0x1b1   :  { %1526 = vmatprep.subr.bf16.mxu0 %v2341_v4  ;;  %1567 = vmatprep.subr.bf16.mxu1 %v2344_v5 }
 0x1b3   :  { %1191 = vmatmul.mubr.bf16.vlgmr.msra.gmra.mrb[12].mxu0 %v755_v2  ;;  %1232 = vmatmul.mubr.bf16.vlgmr.msra.gmra.mrb[12].mxu1 %v755_v2 }
 0x1b4   :  { %1558 = vmatprep.mubr.bf16.mxu0 %v2611_v0  ;;  %1599 = vmatprep.mubr.bf16.mxu1 %v2611_v0 }
 0x1b5   :  { %1527 = vmatpush1.bf16.msra.mxu0 %v2339_v6  ;;  %1568 = vmatpush1.bf16.msra.mxu1 %v2342_v7  ;;  %v1254_v6 = vrot.slane %v1241_v47, %v2726_v3  ;;  %v1258_v7 = vrot.slane %v1241_v47, %v2728_v9  ;;  %v2422_v47 = vld [vmem:[#allocation7 + $0x5ac] ss:$16 sps:$4 sm:$0xff]  }
 0x1b6   :  { %1528 = vmatprep.subr.bf16.mxu0 %v2347_v8  ;;  %1569 = vmatprep.subr.bf16.mxu1 %v2350_v10 }
 0x1b9   :  { %1529 = vmatpush1.bf16.msra.mxu0 %v2345_v11  ;;  %1570 = vmatpush1.bf16.msra.mxu1 %v2348_v12 }
 0x1ba   :  { %1530 = vmatprep.subr.bf16.mxu0 %v2353_v13  ;;  %1571 = vmatprep.subr.bf16.mxu1 %v2356_v14 }
 0x1bd   :  { %1531 = vmatpush1.bf16.msra.mxu0 %v2351_v15  ;;  %1572 = vmatpush1.bf16.msra.mxu1 %v2354_v16 }
 0x1be   :  { %1532 = vmatprep.subr.bf16.mxu0 %v2359_v17  ;;  %1573 = vmatprep.subr.bf16.mxu1 %v2362_v18 }
 0x1c1   :  { %1533 = vmatpush1.bf16.msra.mxu0 %v2357_v19  ;;  %1574 = vmatpush1.bf16.msra.mxu1 %v2360_v20  ;;  %v2061_v19 = vld [vmem:[%s2782_s3 + $0x8] sm:$0xff] }
 0x1c2   :  { %1534 = vmatprep.subr.bf16.mxu0 %v2365_v21  ;;  %1575 = vmatprep.subr.bf16.mxu1 %v2368_v22 }
 0x1c5   :  { %1535 = vmatpush1.bf16.msra.mxu0 %v2363_v23  ;;  %1576 = vmatpush1.bf16.msra.mxu1 %v2366_v24 }
 0x1c6   :  { %1536 = vmatprep.subr.bf16.mxu0 %v2371_v26  ;;  %1577 = vmatprep.subr.bf16.mxu1 %v2374_v28  ;;  %v2387_v28 = vld [vmem:[#allocation7 + $0x500] ss:$16 sps:$4 sm:$0xff]  }
 0x1c9   :  { %1537 = vmatpush1.bf16.msra.mxu0 %v2369_v25  ;;  %1578 = vmatpush1.bf16.msra.mxu1 %v2372_v27 }
 0x1ca   :  { %1538 = vmatprep.subr.bf16.mxu0 %v2377_v29  ;;  %1579 = vmatprep.subr.bf16.mxu1 %v2380_v30  ;;  %v2390_v29 = vld [vmem:[#allocation7 + $0x508] ss:$16 sps:$4 sm:$0xff]  }
 0x1cd   :  { %1539 = vmatpush1.bf16.msra.mxu0 %v2375_v31  ;;  %1580 = vmatpush1.bf16.msra.mxu1 %v2378_v32  ;;  %v2395_v31 = vld [vmem:[#allocation7 + $0x524] ss:$16 sps:$4 sm:$0xff]   ;;  %v2398_v32 = vld [vmem:[#allocation7 + $0x52c] ss:$16 sps:$4 sm:$0xff]  }
 0x1ce   :  { %1540 = vmatprep.subr.bf16.mxu0 %v2383_v33  ;;  %1581 = vmatprep.subr.bf16.mxu1 %v2386_v34  ;;  %v2393_v33 = vld [vmem:[#allocation7 + $0x520] ss:$16 sps:$4 sm:$0xff]   ;;  %v2396_v34 = vld [vmem:[#allocation7 + $0x528] ss:$16 sps:$4 sm:$0xff]  }
 0x1d1   :  { %1541 = vmatpush1.bf16.msra.mxu0 %v2381_v35  ;;  %1582 = vmatpush1.bf16.msra.mxu1 %v2384_v36  ;;  %v2401_v35 = vld [vmem:[#allocation7 + $0x544] ss:$16 sps:$4 sm:$0xff]   ;;  %v2404_v36 = vld [vmem:[#allocation7 + $0x54c] ss:$16 sps:$4 sm:$0xff]  }
 0x1d2   :  { %1768 = vmatprep.subr.bf16.mxu0 %v2389_v37  ;;  %1809 = vmatprep.subr.bf16.mxu1 %v2392_v38  ;;  %v2399_v37 = vld [vmem:[#allocation7 + $0x540] ss:$16 sps:$4 sm:$0xff]   ;;  %v2402_v38 = vld [vmem:[#allocation7 + $0x548] ss:$16 sps:$4 sm:$0xff]  }
 0x266   :  { %v950_v39 = vpop.f32.mrb[8].mxu0  ;;  %v991_v40 = vpop.f32.mrb[8].mxu1 }
 0x267   :  { %v952_v41 = vpop.f32.mrb[9].mxu0  ;;  %v993_v42 = vpop.f32.mrb[9].mxu1 }
 0x268   :  { %v954_v43 = vpop.f32.mrb[10].mxu0  ;;  %v995_v44 = vpop.f32.mrb[10].mxu1 }
 0x269   :  { %v955_v45 = vpop.f32.mrb[11].mxu0  ;;  %v996_v46 = vpop.f32.mrb[11].mxu1  ;;  %v2413_v43 = vld [vmem:[#allocation7 + $0x584] ss:$16 sps:$4 sm:$0xff]   ;;  %v2416_v44 = vld [vmem:[#allocation7 + $0x58c] ss:$16 sps:$4 sm:$0xff]  }
 0x26a   :  { %v2411_v45 = vld [vmem:[#allocation7 + $0x580] ss:$16 sps:$4 sm:$0xff]   ;;  %v2419_v46 = vld [vmem:[#allocation7 + $0x5a4] ss:$16 sps:$4 sm:$0xff]  }
 0x286   :  { %v1192_v49 = vpop.f32.mrb[12].mxu0  ;;  %v1233_v51 = vpop.f32.mrb[12].mxu1 }
 0x287   :  { %v1193_v54 = vadd.f32 %v1192_v49, %v950_v39  ;;  %v1234_v55 = vadd.f32 %v1233_v51, %v991_v40  ;;  %v1194_v56 = vpop.f32.mrb[13].mxu0  ;;  %v1235_v57 = vpop.f32.mrb[13].mxu1  ;;  %v2407_v39 = vld [vmem:[#allocation7 + $0x564] ss:$16 sps:$4 sm:$0xff]   ;;  %v2410_v40 = vld [vmem:[#allocation7 + $0x56c] ss:$16 sps:$4 sm:$0xff]  }
 0x288   :  { %v1195_v58 = vadd.f32 %v1194_v56, %v952_v41  ;;  %v1236_v59 = vadd.f32 %v1235_v57, %v993_v42  ;;  %v1196_v60 = vpop.f32.mrb[14].mxu0  ;;  %v1237_v61 = vpop.f32.mrb[14].mxu1  ;;  %v2405_v41 = vld [vmem:[#allocation7 + $0x560] ss:$16 sps:$4 sm:$0xff]   ;;  %v2408_v42 = vld [vmem:[#allocation7 + $0x568] ss:$16 sps:$4 sm:$0xff]  }
 0x289   :  { %v1263_v62 = vadd.f32 %v1246_v48, %v1193_v54  ;;  %v1197_v63 = vpop.f32.mrb[15].mxu0  ;;  %v1238_v1 = vpop.f32.mrb[15].mxu1  ;;  %v1265_v8 = vadd.f32 %v1254_v6, %v1234_v55  ;;  %v2417_v48 = vld [vmem:[#allocation7 + $0x5a0] ss:$16 sps:$4 sm:$0xff]   ;;  %v2420_v49 = vld [vmem:[#allocation7 + $0x5a8] ss:$16 sps:$4 sm:$0xff]  }
 0x28a   :  { %v1264_v2 = vadd.f32 %v1250_v53, %v1195_v58  ;;  %v1266_v10 = vadd.f32 %v1258_v7, %v1236_v59  ;;  %v2425_v51 = vld [vmem:[#allocation7 + $0x5c4] ss:$16 sps:$4 sm:$0xff]   ;;  %v2428_v53 = vld [vmem:[#allocation7 + $0x5cc] ss:$16 sps:$4 sm:$0xff]   ;;  %v2423_v54 = vld [vmem:[#allocation7 + $0x5c0] ss:$16 sps:$4 sm:$0xff]  }
 0x28b   :  { %v2062_v4 = vmul.f32 -1.442695, %v1263_v62  ;;  %v2064_v11 = vmul.f32 -1.442695, %v1265_v8  ;;  %v2426_v55 = vld [vmem:[#allocation7 + $0x5c8] ss:$16 sps:$4 sm:$0xff]  }
 0x28c   :  { %v2063_v5 = vmul.f32 -1.442695, %v1264_v2  ;;  %v2431_v56 = vld [vmem:[#allocation7 + $0x5e4] ss:$16 sps:$4 sm:$0xff]   ;;  %v2434_v57 = vld [vmem:[#allocation7 + $0x5ec] ss:$16 sps:$4 sm:$0xff]  }
 0x28d   :  { %2451 = vpow2.f32 %v2062_v4  ;;  %v2429_v58 = vld [vmem:[#allocation7 + $0x5e0] ss:$16 sps:$4 sm:$0xff]   ;;  %v2432_v59 = vld [vmem:[#allocation7 + $0x5e8] ss:$16 sps:$4 sm:$0xff]  }
 0x28e   :  { %2453 = vpow2.f32 %v2063_v5  ;;  %v1364_v60 = vld [vmem:[#allocation5 + $0x10] sm:$0xff]  ;;  %v1851_v8 = vld [vmem:[#allocation8 + $0x8] sm:$0xf] }
 0x28f   :  { %2455 = vtanh.f32 %v1266_v10  ;;  %v1365_v61 = vpack.c.bf16 %v1364_v60, %v1364_v60  ;;  %v1856_v10 = vrot.slane %v1851_v8, %v2720_v50  ;;  %v1864_v50 = vrot.slane %v1851_v8, %v2726_v3  ;;  %v2130_v3 = vld [vmem:[%s2782_s3 + $0x10] sm:$0xff] }
 0x290   :  { %2457 = vpow2.f32 %v2064_v11 }
 0x297   :  { %v2452_v12 = vpop.eup %2451 }
 0x298   :  { %v1278_v13 = vadd.f32 1.0, %v2452_v12  ;;  %v2454_v14 = vpop.eup %2453 }
 0x299   :  { %v1279_v15 = vadd.f32 1.0, %v2454_v14  ;;  %v2456_v16 = vpop.eup %2455 }
 0x29a   :  { %2459 = vrcp.f32 %v1278_v13  ;;  %v2458_v17 = vpop.eup %2457  ;;  %v1860_v13 = vrot.slane %v1851_v8, %v2722_v52  ;;  %v1868_v52 = vrot.slane %v1851_v8, %v2728_v9 }
 0x29b   :  { %2461 = vrcp.f32 %v1279_v15  ;;  %v1280_v22 = vadd.f32 1.0, %v2458_v17 }
 0x29d   :  { %2463 = vrcp.f32 %v1280_v22 }
 0x2a4   :  { %v2460_v18 = vpop.eup %2459 }
 0x2a5   :  { %v1289_v20 = vmul.f32 %v2460_v18, %v2456_v16  ;;  %v2462_v21 = vpop.eup %2461 }
 0x2a6   :  { %v1288_v23 = vmul.f32 %v2462_v21, %v2061_v19 }
 0x2a7   :  { %v2464_v25 = vpop.eup %2463 }
 0x2a8   :  { %v1290_v24 = vadd.f32 %v1289_v20, %v1288_v23 }
 0x2aa   :  { %2465 = vtanh.f32 %v1290_v24  ;;  %1296 = vst [vmem:[#allocation10 + $0x8] sm:$0xff] %v1290_v24 }
 0x2b4   :  { %v2466_v26 = vpop.eup %2465 }
 0x2b5   :  { %v1292_v27 = vmul.f32 %v2466_v26, %v2464_v25 }
 0x2b7   :  { %2065 = vst [vmem:[%s2785_s6 + $0x8] sm:$0xff] %v1292_v27  ;;  %v1297_v30 = vpack.c.bf16 %v1292_v27, %v1292_v27 }
 0x2b9   :  { %1559 = vmatmul.mubr.bf16.vlgmr.msra.gmra.mrb[16].mxu0 %v1297_v30  ;;  %1600 = vmatmul.mubr.bf16.vlgmr.msra.gmra.mrb[16].mxu1 %v1297_v30 }
 0x2ba   :  { %1769 = vmatpush1.bf16.msra.mxu0 %v2387_v28  ;;  %1810 = vmatpush1.bf16.msra.mxu1 %v2390_v29 }
 0x2bb   :  { %1770 = vmatprep.subr.bf16.mxu0 %v2395_v31  ;;  %1811 = vmatprep.subr.bf16.mxu1 %v2398_v32 }
 0x2bc   :  { %1800 = vmatprep.mubr.bf16.mxu0 %v2611_v0  ;;  %1841 = vmatprep.mubr.bf16.mxu1 %v2611_v0  ;;  %v2414_v0 = vld [vmem:[#allocation7 + $0x588] ss:$16 sps:$4 sm:$0xff]  }
 0x2be   :  { %1771 = vmatpush1.bf16.msra.mxu0 %v2393_v33  ;;  %1812 = vmatpush1.bf16.msra.mxu1 %v2396_v34 }
 0x2bf   :  { %1772 = vmatprep.subr.bf16.mxu0 %v2401_v35  ;;  %1813 = vmatprep.subr.bf16.mxu1 %v2404_v36 }
 0x2c2   :  { %1773 = vmatpush1.bf16.msra.mxu0 %v2399_v37  ;;  %1814 = vmatpush1.bf16.msra.mxu1 %v2402_v38 }
 0x2c3   :  { %1774 = vmatprep.subr.bf16.mxu0 %v2407_v39  ;;  %1815 = vmatprep.subr.bf16.mxu1 %v2410_v40 }
 0x2c6   :  { %1775 = vmatpush1.bf16.msra.mxu0 %v2405_v41  ;;  %1816 = vmatpush1.bf16.msra.mxu1 %v2408_v42 }
 0x2c7   :  { %1776 = vmatprep.subr.bf16.mxu0 %v2413_v43  ;;  %1817 = vmatprep.subr.bf16.mxu1 %v2416_v44 }
 0x2ca   :  { %1777 = vmatpush1.bf16.msra.mxu0 %v2411_v45  ;;  %1818 = vmatpush1.bf16.msra.mxu1 %v2414_v0 }
 0x2cb   :  { %1778 = vmatprep.subr.bf16.mxu0 %v2419_v46  ;;  %1819 = vmatprep.subr.bf16.mxu1 %v2422_v47 }
 0x2ce   :  { %1779 = vmatpush1.bf16.msra.mxu0 %v2417_v48  ;;  %1820 = vmatpush1.bf16.msra.mxu1 %v2420_v49 }
 0x2cf   :  { %1780 = vmatprep.subr.bf16.mxu0 %v2425_v51  ;;  %1821 = vmatprep.subr.bf16.mxu1 %v2428_v53 }
 0x2d2   :  { %1781 = vmatpush1.bf16.msra.mxu0 %v2423_v54  ;;  %1822 = vmatpush1.bf16.msra.mxu1 %v2426_v55 }
 0x2d3   :  { %1782 = vmatprep.subr.bf16.mxu0 %v2431_v56  ;;  %1823 = vmatprep.subr.bf16.mxu1 %v2434_v57 }
 0x2d6   :  { %1783 = vmatpush1.bf16.msra.mxu0 %v2429_v58  ;;  %1824 = vmatpush1.bf16.msra.mxu1 %v2432_v59 }
 0x2d9   :  { %1801 = vmatmul.mubr.bf16.vlgmr.msra.gmra.mrb[20].mxu0 %v1365_v61  ;;  %1842 = vmatmul.mubr.bf16.vlgmr.msra.gmra.mrb[20].mxu1 %v1365_v61 }
 0x38c   :  { %v1560_v62 = vpop.f32.mrb[16].mxu0  ;;  %v1601_v63 = vpop.f32.mrb[16].mxu1 }
 0x38d   :  { %v1562_v1 = vpop.f32.mrb[17].mxu0  ;;  %v1603_v2 = vpop.f32.mrb[17].mxu1 }
 0x38e   :  { %v1564_v4 = vpop.f32.mrb[18].mxu0  ;;  %v1605_v5 = vpop.f32.mrb[18].mxu1 }
 0x38f   :  { %v1565_v6 = vpop.f32.mrb[19].mxu0  ;;  %v1606_v7 = vpop.f32.mrb[19].mxu1 }
 0x3ac   :  { %v1802_v11 = vpop.f32.mrb[20].mxu0  ;;  %v1843_v12 = vpop.f32.mrb[20].mxu1 }
 0x3ad   :  { %v1803_v14 = vadd.f32 %v1802_v11, %v1560_v62  ;;  %v1844_v15 = vadd.f32 %v1843_v12, %v1601_v63  ;;  %v1804_v16 = vpop.f32.mrb[21].mxu0  ;;  %v1845_v17 = vpop.f32.mrb[21].mxu1 }
 0x3ae   :  { %v1805_v18 = vadd.f32 %v1804_v16, %v1562_v1  ;;  %v1846_v19 = vadd.f32 %v1845_v17, %v1603_v2  ;;  %v1806_v20 = vpop.f32.mrb[22].mxu0  ;;  %v1847_v21 = vpop.f32.mrb[22].mxu1 }
 0x3af   :  { %v1873_v22 = vadd.f32 %v1856_v10, %v1803_v14  ;;  %v1807_v23 = vpop.f32.mrb[23].mxu0  ;;  %v1848_v24 = vpop.f32.mrb[23].mxu1  ;;  %v1875_v28 = vadd.f32 %v1864_v50, %v1844_v15 }
 0x3b0   :  { %v1874_v25 = vadd.f32 %v1860_v13, %v1805_v18  ;;  %v1876_v29 = vadd.f32 %v1868_v52, %v1846_v19 }
 0x3b1   :  { %v2131_v26 = vmul.f32 -1.442695, %v1873_v22  ;;  %v2133_v30 = vmul.f32 -1.442695, %v1875_v28 }
 0x3b2   :  { %v2132_v27 = vmul.f32 -1.442695, %v1874_v25 }
 0x3b3   :  { %2467 = vpow2.f32 %v2131_v26 }
 0x3b4   :  { %2469 = vpow2.f32 %v2132_v27 }
 0x3b5   :  { %2471 = vtanh.f32 %v1876_v29 }
 0x3b6   :  { %2473 = vpow2.f32 %v2133_v30 }
 0x3bd   :  { %v2468_v31 = vpop.eup %2467 }
 0x3be   :  { %v1888_v32 = vadd.f32 1.0, %v2468_v31  ;;  %v2470_v33 = vpop.eup %2469 }
 0x3bf   :  { %v1889_v34 = vadd.f32 1.0, %v2470_v33  ;;  %v2472_v35 = vpop.eup %2471 }
 0x3c0   :  { %2475 = vrcp.f32 %v1888_v32  ;;  %v2474_v36 = vpop.eup %2473 }
 0x3c1   :  { %2477 = vrcp.f32 %v1889_v34  ;;  %v1890_v39 = vadd.f32 1.0, %v2474_v36 }
 0x3c3   :  { %2479 = vrcp.f32 %v1890_v39 }
 0x3ca   :  { %v2476_v37 = vpop.eup %2475 }
 0x3cb   :  { %v1899_v38 = vmul.f32 %v2476_v37, %v2472_v35  ;;  %v2478_v9 = vpop.eup %2477 }
 0x3cc   :  { %v1898_v40 = vmul.f32 %v2478_v9, %v2130_v3 }
 0x3ce   :  { %v1900_v41 = vadd.f32 %v1899_v38, %v1898_v40 }
 0x3d0   :  { %2481 = vtanh.f32 %v1900_v41  ;;  %1906 = vst [vmem:[#allocation10 + $0x10] sm:$0xff] %v1900_v41 }
 0x3d1   :  { %2582 = shalt.err (!%p2579_p8)
}
 0x3d2   :  { %s2583_s22 = scalar_lea.hbm %s2786_s7, 384 }
 0x3d3   :  { %p2584_p9 = scmp.ne.s32.totalorder %s2786_s7, %s2583_s22  ;;  %p2587_p10 = scmp.lt.u32.totalorder %s2583_s22, %s2786_s7 }
 0x3d5   :  { %p2589_p11 = pnand %p2587_p10, %p2584_p9 }
 0x3d7   :  { %2592 = shalt.err (!%p2589_p11)
}
 0x3d8   :  { %1920 = dma.vmem_to_hbm [thread:$0]  %s1915_s19, 384, %s2786_s7, [#allocation4], %s2602_s11, %s2602_s11, %s2603_s12   ;;  %v2480_v42 = vpop.eup %2479 }
 0x3da   :  { %v2482_v43 = vpop.eup %2481 }
 0x3db   :  { %v1902_v44 = vmul.f32 %v2482_v43, %v2480_v42 }
 0x3dd   :  { %2134 = vst [vmem:[%s2785_s6 + $0x10] sm:$0xff] %v1902_v44 }
 0x3de   :  { %2599 = dma.done.wait [#allocation4], 384  }
 0x3df   :  { %2600 = vsyncadd [#allocation4], 4294966912 }
 0x3e0   :  { %1926 = vsyncpa [#allocation3], 1 }
 0x3e1   :  { %1927 = vsyncpa [#allocation6], 1 }
 0x3e2   :  { %1928 = vsyncpa [#allocation9], 1 }
 0x3e3   :  { %1929 = vsyncpa [#allocation4], 1 }

</bundles_post_ra>
